<compile_context>
chip_gen: v7x
topology: tpu7x:2x2x1
jax: 0.10.0
libtpu: 0.0.40
codegen_flags: <defaults>
</compile_context>

<pallas_src>
import functools

import jax
import jax.numpy as jnp
from jax import lax
from jax.experimental import pallas as pl
from jax.experimental.pallas import tpu as pltpu

_INV127 = 1.0 / 127.0
_INV127_SQ = _INV127 * _INV127


def _linear8bit_kernel(flags_ref,   # [K//tk] int32 (scalar prefetch, SMEM): k-tile has outliers?
                       kidx_ref,    # [K//tk] int32 (scalar prefetch, SMEM): x_out block idx per k
                       ca_ref,      # [tm, tk] int8  quantized non-outlier activations
                       xo_ref,      # [tm, tk] bf16  outlier activations (deduped fetch)
                       cw_ref,      # [tn, tk] int8  quantized weights
                       rs_ref,      # [tm, 1]  f32   per-row activation scale
                       sw_ref,      # [1, tn]  f32   per-output-row weight scale
                       b_ref,       # [1, tn]  f32   bias
                       o_ref,       # [tm, tn] output
                       acc_q_ref,   # [tm, tn] int32 (int8 path) / f32 (bf16 path) accumulator
                       acc_c_ref,   # [tm, tn] f32   outlier-correction accumulator
                       *, use_int8_mxu):
    del kidx_ref  # only consumed by the x_out index_map
    k = pl.program_id(2)

    @pl.when(k == 0)
    def _init():
        acc_q_ref[...] = jnp.zeros_like(acc_q_ref)
        acc_c_ref[...] = jnp.zeros_like(acc_c_ref)

    # Contract the last dim of both operands -> weights stay [N, K]; no transposes.
    dn = (((1,), (1,)), ((), ()))
    cw = cw_ref[...]

    if use_int8_mxu:
        # v4/v5/v6: int8 x int8 -> int32 on the MXU, exact int32 accumulation in VMEM scratch.
        acc_q_ref[...] += lax.dot_general(ca_ref[...], cw, dn,
                                          preferred_element_type=jnp.int32)

        @pl.when(flags_ref[k] > 0)
        def _corr():
            acc_c_ref[...] += lax.dot_general(xo_ref[...], cw.astype(jnp.bfloat16), dn,
                                              preferred_element_type=jnp.float32)
    else:
        # v7x (no integer MXU): bf16 operands are exact for int8-valued data. Hoist the cast so
        # the quantized matmul and the (rare) correction share one int8->bf16 conversion.
        cw_bf16 = cw.astype(jnp.bfloat16)
        acc_q_ref[...] += lax.dot_general(ca_ref[...].astype(jnp.bfloat16), cw_bf16, dn,
                                          preferred_element_type=jnp.float32)

        @pl.when(flags_ref[k] > 0)
        def _corr():
            acc_c_ref[...] += lax.dot_general(xo_ref[...], cw_bf16, dn,
                                              preferred_element_type=jnp.float32)

    # Fused epilogue: dequant + correction scale + bias, one lane-dense store.
    @pl.when(k == pl.num_programs(2) - 1)
    def _epilogue():
        rs = rs_ref[...]                       # [tm, 1]
        sw = sw_ref[...]                       # [1, tn]
        y = (acc_q_ref[...].astype(jnp.float32) * (rs * (sw * _INV127_SQ))
             + acc_c_ref[...] * (sw * _INV127)
             + b_ref[...])
        o_ref[...] = y.astype(o_ref.dtype)


def _round_up(x, m):
    return ((x + m - 1) // m) * m


def _pick_tile(dim, prefs):
    """Largest preferred tile that evenly divides the (already padded) dim."""
    for p in prefs:
        if dim % p == 0:
            return p
    return prefs[-1]


def _pad2(a, rows, cols, value=0):
    pr, pc = rows - a.shape[0], cols - a.shape[1]
    if pr == 0 and pc == 0:
        return a
    return jnp.pad(a, ((0, pr), (0, pc)), constant_values=value)


def _default_use_int8_mxu():
    """int8 MXU everywhere except v7x (no integer MXU); overridable via linear8bit(use_int8_mxu=...)."""
    try:
        kind = jax.devices()[0].device_kind.lower()
    except Exception:
        return True
    return "v7" not in kind


def _device_vmem_cap_bytes():
    """Conservative per-generation cap for vmem_limit_bytes (v7x has only 64 MiB physical VMEM)."""
    try:
        kind = jax.devices()[0].device_kind.lower()
    except Exception:
        kind = ""
    return (48 if "v7" in kind else 96) * 1024 * 1024


def quantize_weights(w):
    """Per-output-row symmetric int8 quantization (matches `quantize` in the torch code)."""
    scale = jnp.max(jnp.abs(w), axis=1, keepdims=True)            # [N, 1]
    safe = jnp.where(scale == 0.0, 1.0, scale)
    cw = jnp.trunc(w * 127.0 / safe).astype(jnp.int8)             # [N, K]
    return cw, scale[:, 0].astype(jnp.float32)                    # int8 [N,K], f32 [N]


def linear8bit(x, cweight, scale, bias=None, threshold=6.0, use_int8_mxu=None):
    """Pallas-backed Linear8bit forward. x:[M,K] float, cweight:[N,K] int8, scale:[N] f32."""
    M, K = x.shape
    N, Kw = cweight.shape
    assert K == Kw
    out_dtype = x.dtype
    x = x.astype(jnp.float32)
    if use_int8_mxu is None:
        use_int8_mxu = _default_use_int8_mxu()

    # ---- Hoisted preprocessing (global reductions over batch / K; cheap memory-bound XLA) ----
    outlier = jnp.max(jnp.abs(x), axis=0, keepdims=True) > threshold        # [1, K]
    x_low = jnp.where(outlier, 0.0, x)
    x_out = jnp.where(outlier, x, 0.0).astype(jnp.bfloat16)                 # correction operand
    row_scale = jnp.max(jnp.abs(x_low), axis=1, keepdims=True)              # [M, 1]
    safe_scale = jnp.where(row_scale == 0.0, 1.0, row_scale)                # guard div-by-zero
    cA = jnp.trunc(x_low * 127.0 / safe_scale).astype(jnp.int8)             # [M, K] int8

    # ---- Padding (no full-dim tile fallback) ----
    m_pad = _round_up(M, 8)
    n_pad = _round_up(N, 128)
    k_pad = _round_up(K, 128)

    # ---- Tile selection: large tiles, MXU-friendly, keep >=2 parallel blocks (v7x megacore) ----
    tm = m_pad if m_pad <= 512 else _pick_tile(m_pad, (512, 256, 128, 64, 32, 16, 8))
    tn = _pick_tile(n_pad, (512, 256, 128))
    tk = _pick_tile(k_pad, (1024, 512, 256, 128))
    while (m_pad // tm) * (n_pad // tn) < 2:
        if tn > 128:
            tn //= 2
        elif tm >= 16 and (tm // 2) % 8 == 0:
            tm //= 2
        else:
            break
    grid = (m_pad // tm, n_pad // tn, k_pad // tk)
    nk = grid[2]

    cA_p = _pad2(cA, m_pad, k_pad)
    xo_p = _pad2(x_out, m_pad, k_pad)
    cw_p = _pad2(cweight, n_pad, k_pad)
    rs_p = _pad2(row_scale.astype(jnp.float32), m_pad, 1, value=1.0)
    sw_p = _pad2(scale.reshape(1, N).astype(jnp.float32), 1, n_pad)
    b = bias if bias is not None else jnp.zeros((N,), jnp.float32)
    b_p = _pad2(b.reshape(1, N).astype(jnp.float32), 1, n_pad)

    # Per-K-tile "contains an outlier column" flags + deduplicated x_out block index:
    # for outlier-free tiles the x_out index_map repeats the previous outlier tile's block index,
    # so Pallas skips the bf16 re-fetch entirely (the correction matmul is gated by flags).
    out_mask = _pad2(outlier, 1, k_pad)[0]
    flags_b = out_mask.reshape(nk, tk).any(axis=1)                          # [nk] bool
    kidx = lax.cummax(jnp.where(flags_b, jnp.arange(nk, dtype=jnp.int32), -1))
    kidx = jnp.maximum(kidx, 0).astype(jnp.int32)
    flags = flags_b.astype(jnp.int32)

    kernel = functools.partial(_linear8bit_kernel, use_int8_mxu=use_int8_mxu)
    acc_q_dtype = jnp.int32 if use_int8_mxu else jnp.float32

    grid_spec = pltpu.PrefetchScalarGridSpec(
        num_scalar_prefetch=2,
        grid=grid,
        in_specs=[
            pl.BlockSpec((tm, tk), lambda i, j, k, fl, ki: (i, k)),         # cA
            pl.BlockSpec((tm, tk), lambda i, j, k, fl, ki: (i, ki[k])),     # x_out (deduped)
            pl.BlockSpec((tn, tk), lambda i, j, k, fl, ki: (j, k)),         # cweight
            pl.BlockSpec((tm, 1), lambda i, j, k, fl, ki: (i, 0)),          # row_scale
            pl.BlockSpec((1, tn), lambda i, j, k, fl, ki: (0, j)),          # weight scale
            pl.BlockSpec((1, tn), lambda i, j, k, fl, ki: (0, j)),          # bias
        ],
        out_specs=pl.BlockSpec((tm, tn), lambda i, j, k, fl, ki: (i, j)),
        scratch_shapes=[pltpu.VMEM((tm, tn), acc_q_dtype),
                        pltpu.VMEM((tm, tn), jnp.float32)],
    )

    out_bytes = jnp.dtype(out_dtype).itemsize
    vmem_est = (2 * (tm * tk * 1 + tm * tk * 2 + tn * tk * 1
                     + tm * 4 + 2 * tn * 4 + tm * tn * out_bytes)
                + 2 * tm * tn * 4)
    vmem_limit = int(min(_device_vmem_cap_bytes(), max(32 * 1024 * 1024, 2 * vmem_est)))

    cost = pl.CostEstimate(
        flops=2 * m_pad * n_pad * k_pad,
        transcendentals=0,
        bytes_accessed=int(m_pad * k_pad                                    # cA once
                           + (m_pad // tm) * n_pad * k_pad                  # weight re-streams
                           + m_pad * n_pad * out_bytes
                           + (m_pad + 2 * n_pad) * 4),
    )

    y = pl.pallas_call(
        kernel,
        out_shape=jax.ShapeDtypeStruct((m_pad, n_pad), out_dtype),
        grid_spec=grid_spec,
        compiler_params=pltpu.CompilerParams(
            dimension_semantics=("parallel", "parallel", "arbitrary"),
            vmem_limit_bytes=vmem_limit,
        ),
        cost_estimate=cost,
    )(flags, kidx, cA_p, xo_p, cw_p, rs_p, sw_p, b_p)

    return y[:M, :N]


def _reference(x, cweight, scale, bias, threshold=6.0):
    """Pure-JAX replica of the torch forward (correction at bf16 operand precision)."""
    x = x.astype(jnp.float32)
    cwf = cweight.astype(jnp.float32)
    outlier = jnp.max(jnp.abs(x), axis=0, keepdims=True) > threshold
    x_low = jnp.where(outlier, 0.0, x)
    x_out = jnp.where(outlier, x, 0.0)
    rs = jnp.max(jnp.abs(x_low), axis=1, keepdims=True)
    safe = jnp.where(rs == 0.0, 1.0, rs)
    cA = jnp.trunc(x_low * 127.0 / safe)
    y = jnp.dot(cA, cwf.T) * (rs / 127.0) * (scale[None, :] / 127.0)
    corr = jnp.dot(x_out.astype(jnp.bfloat16), cweight.astype(jnp.bfloat16).T,
                   preferred_element_type=jnp.float32)
    y = y + corr * (scale[None, :] / 127.0)
    if bias is not None:
        y = y + bias[None, :]
    return y


if __name__ == "__main__":
    key = jax.random.PRNGKey(0)
    kx, kw, kb = jax.random.split(key, 3)

    # Small but tile-aligned linear-layer shapes: batch=32, in_features=768, out_features=512.
    M, K, N = 32, 768, 512
    x = jax.random.normal(kx, (M, K), dtype=jnp.float32)
    x = x.at[:, 3].multiply(10.0)      # outlier feature in K-tile 0
    x = x.at[:, 700].multiply(10.0)    # outlier feature in K-tile 2 (tile 1 stays outlier-free)
    w = jax.random.normal(kw, (N, K), dtype=jnp.float32)
    bias = jax.random.normal(kb, (N,), dtype=jnp.float32)

    # "Module init": quantize weights once (as Linear8bit.__init__ does).
    cweight, scale = quantize_weights(w)

    # Path 1: with outliers (exercises the gated correction + deduped x_out fetch).
    y = linear8bit(x, cweight, scale, bias, threshold=6.0)
    y = jax.block_until_ready(y)
    y_ref = _reference(x, cweight, scale, bias, threshold=6.0)
    assert y.shape == (M, N)
    err1 = jnp.max(jnp.abs(y - y_ref))
    assert jnp.allclose(y, y_ref, rtol=1e-2, atol=1e-2), f"Pallas mismatch (outliers), max err={err1}"

    # Path 2: threshold so high that there are no outliers (pure int8 path, no bias).
    y2 = linear8bit(x, cweight, scale, None, threshold=1e9)
    y2 = jax.block_until_ready(y2)
    y2_ref = _reference(x, cweight, scale, None, threshold=1e9)
    err2 = jnp.max(jnp.abs(y2 - y2_ref))
    assert jnp.allclose(y2, y2_ref, rtol=1e-2, atol=1e-2), f"Pallas mismatch (no outliers), max err={err2}"

    print("KERNEL_OK")
</pallas_src>

<mosaic_0001>
module attributes {stable_mosaic.version = 11 : i64} {
  func.func @_linear8bit_kernel(%arg0: i32, %arg1: i32, %arg2: i32, %arg3: memref<3xi32, #tpu.memory_space<smem>>, %arg4: memref<3xi32, #tpu.memory_space<smem>>, %arg5: memref<32x256xi8, #tpu.memory_space<vmem>>, %arg6: memref<32x256xbf16, #tpu.memory_space<vmem>>, %arg7: memref<256x256xi8, #tpu.memory_space<vmem>>, %arg8: memref<32x1xf32, #tpu.memory_space<vmem>>, %arg9: memref<1x256xf32, #tpu.memory_space<vmem>>, %arg10: memref<1x256xf32, #tpu.memory_space<vmem>>, %arg11: memref<32x256xf32, #tpu.memory_space<vmem>>, %arg12: memref<32x256xi32, #tpu.memory_space<vmem>>, %arg13: memref<32x256xf32, #tpu.memory_space<vmem>>) attributes {dimension_semantics = [#tpu.dimension_semantics<parallel>, #tpu.dimension_semantics<parallel>, #tpu.dimension_semantics<arbitrary>], iteration_bounds = array<i64: 1, 2, 3>, scalar_prefetch = 2 : i64, scratch_operands = 2 : i64, tpu.core_type = #tpu.core_type<tc>, window_params = [{transform_indices = @transform_0, window_bounds = array<i64: 32, 256>}, {transform_indices = @transform_1, window_bounds = array<i64: 32, 256>}, {transform_indices = @transform_2, window_bounds = array<i64: 256, 256>}, {transform_indices = @transform_3, window_bounds = array<i64: 32, 1>}, {transform_indices = @transform_4, window_bounds = array<i64: 1, 256>}, {transform_indices = @transform_5, window_bounds = array<i64: 1, 256>}, {transform_indices = @transform_6, window_bounds = array<i64: 32, 256>}]} {
    %c0_i32 = arith.constant 0 : i32
    %0 = arith.cmpi eq, %arg2, %c0_i32 : i32
    %1 = arith.extui %0 : i1 to i32
    %c0_i32_0 = arith.constant 0 : i32
    %2 = arith.cmpi ne, %1, %c0_i32_0 : i32
    scf.if %2 {
      %c0_i32_11 = arith.constant 0 : i32
      %17 = vector.broadcast %c0_i32_11 : i32 to vector<32x256xi32>
      %c0_12 = arith.constant 0 : index
      %c0_13 = arith.constant 0 : index
      %18 = vector.load %arg12[%c0_12, %c0_13] : memref<32x256xi32, #tpu.memory_space<vmem>>, vector<32x256xi32>
      tpu.vector_store %arg12[%c0_12, %c0_13], %17 {strides = array<i32>} : memref<32x256xi32, #tpu.memory_space<vmem>>, vector<32x256xi32>,
      %cst_14 = arith.constant 0.000000e+00 : f32
      %19 = vector.broadcast %cst_14 : f32 to vector<32x256xf32>
      %c0_15 = arith.constant 0 : index
      %c0_16 = arith.constant 0 : index
      %20 = vector.load %arg13[%c0_15, %c0_16] : memref<32x256xf32, #tpu.memory_space<vmem>>, vector<32x256xf32>
      tpu.vector_store %arg13[%c0_15, %c0_16], %19 {strides = array<i32>} : memref<32x256xf32, #tpu.memory_space<vmem>>, vector<32x256xf32>,
    } else {
    }
    %c0 = arith.constant 0 : index
    %c0_1 = arith.constant 0 : index
    %3 = vector.load %arg7[%c0, %c0_1] : memref<256x256xi8, #tpu.memory_space<vmem>>, vector<256x256xi8>
    %c0_2 = arith.constant 0 : index
    %c0_3 = arith.constant 0 : index
    %4 = vector.load %arg12[%c0_2, %c0_3] : memref<32x256xi32, #tpu.memory_space<vmem>>, vector<32x256xi32>
    %c0_4 = arith.constant 0 : index
    %c0_5 = arith.constant 0 : index
    %5 = vector.load %arg5[%c0_4, %c0_5] : memref<32x256xi8, #tpu.memory_space<vmem>>, vector<32x256xi8>
    %cst = arith.constant dense<0> : vector<32x256xi32>
    %6 = tpu.matmul %5, %3, %cst {dimension_numbers = #tpu.dot_dimension_numbers<[1], [1], [0], [0], [0, 0, 1, 0], [], []>} : vector<32x256xi8>, vector<256x256xi8>, vector<32x256xi32> -> vector<32x256xi32>
    %7 = arith.addi %4, %6 : vector<32x256xi32>
    %c0_6 = arith.constant 0 : index
    %c0_7 = arith.constant 0 : index
    %8 = vector.load %arg12[%c0_6, %c0_7] : memref<32x256xi32, #tpu.memory_space<vmem>>, vector<32x256xi32>
    tpu.vector_store %arg12[%c0_6, %c0_7], %7 {strides = array<i32>} : memref<32x256xi32, #tpu.memory_space<vmem>>, vector<32x256xi32>,
    %9 = arith.index_cast %arg2 : i32 to index
    %10 = memref.load %arg3[%9] : memref<3xi32, #tpu.memory_space<smem>>
    %c0_i32_8 = arith.constant 0 : i32
    %11 = arith.cmpi sgt, %10, %c0_i32_8 : i32
    %12 = arith.extui %11 : i1 to i32
    %c0_i32_9 = arith.constant 0 : i32
    %13 = arith.cmpi ne, %12, %c0_i32_9 : i32
    scf.if %13 {
      %c0_11 = arith.constant 0 : index
      %c0_12 = arith.constant 0 : index
      %17 = vector.load %arg13[%c0_11, %c0_12] : memref<32x256xf32, #tpu.memory_space<vmem>>, vector<32x256xf32>
      %c0_13 = arith.constant 0 : index
      %c0_14 = arith.constant 0 : index
      %18 = vector.load %arg6[%c0_13, %c0_14] : memref<32x256xbf16, #tpu.memory_space<vmem>>, vector<32x256xbf16>
      %19 = arith.sitofp %3 : vector<256x256xi8> to vector<256x256xbf16>
      %cst_15 = arith.constant dense<0.000000e+00> : vector<32x256xf32>
      %20 = tpu.matmul %18, %19, %cst_15 {dimension_numbers = #tpu.dot_dimension_numbers<[1], [1], [0], [0], [0, 0, 1, 0], [], []>} : vector<32x256xbf16>, vector<256x256xbf16>, vector<32x256xf32> -> vector<32x256xf32>
      %21 = arith.addf %17, %20 : vector<32x256xf32>
      %c0_16 = arith.constant 0 : index
      %c0_17 = arith.constant 0 : index
      %22 = vector.load %arg13[%c0_16, %c0_17] : memref<32x256xf32, #tpu.memory_space<vmem>>, vector<32x256xf32>
      tpu.vector_store %arg13[%c0_16, %c0_17], %21 {strides = array<i32>} : memref<32x256xf32, #tpu.memory_space<vmem>>, vector<32x256xf32>,
    } else {
    }
    %c2_i32 = arith.constant 2 : i32
    %14 = arith.cmpi eq, %arg2, %c2_i32 : i32
    %15 = arith.extui %14 : i1 to i32
    %c0_i32_10 = arith.constant 0 : i32
    %16 = arith.cmpi ne, %15, %c0_i32_10 : i32
    scf.if %16 {
      %c0_11 = arith.constant 0 : index
      %c0_12 = arith.constant 0 : index
      %17 = vector.load %arg8[%c0_11, %c0_12] : memref<32x1xf32, #tpu.memory_space<vmem>>, vector<32x1xf32>
      %c0_13 = arith.constant 0 : index
      %c0_14 = arith.constant 0 : index
      %18 = vector.load %arg9[%c0_13, %c0_14] : memref<1x256xf32, #tpu.memory_space<vmem>>, vector<1x256xf32>
      %c0_15 = arith.constant 0 : index
      %c0_16 = arith.constant 0 : index
      %19 = vector.load %arg12[%c0_15, %c0_16] : memref<32x256xi32, #tpu.memory_space<vmem>>, vector<32x256xi32>
      %20 = arith.sitofp %19 : vector<32x256xi32> to vector<32x256xf32>
      %cst_17 = arith.constant 6.20001229E-5 : f32
      %21 = vector.broadcast %cst_17 : f32 to vector<1x256xf32>
      %22 = arith.mulf %18, %21 : vector<1x256xf32>
      %23 = vector.broadcast %17 : vector<32x1xf32> to vector<32x256xf32>
      %24 = vector.broadcast %22 : vector<1x256xf32> to vector<32x256xf32>
      %25 = arith.mulf %23, %24 : vector<32x256xf32>
      %26 = arith.mulf %20, %25 : vector<32x256xf32>
      %c0_18 = arith.constant 0 : index
      %c0_19 = arith.constant 0 : index
      %27 = vector.load %arg13[%c0_18, %c0_19] : memref<32x256xf32, #tpu.memory_space<vmem>>, vector<32x256xf32>
      %cst_20 = arith.constant 0.00787401571 : f32
      %28 = vector.broadcast %cst_20 : f32 to vector<1x256xf32>
      %29 = arith.mulf %18, %28 : vector<1x256xf32>
      %30 = vector.broadcast %29 : vector<1x256xf32> to vector<32x256xf32>
      %31 = arith.mulf %27, %30 : vector<32x256xf32>
      %32 = arith.addf %26, %31 : vector<32x256xf32>
      %c0_21 = arith.constant 0 : index
      %c0_22 = arith.constant 0 : index
      %33 = vector.load %arg10[%c0_21, %c0_22] : memref<1x256xf32, #tpu.memory_space<vmem>>, vector<1x256xf32>
      %34 = vector.broadcast %33 : vector<1x256xf32> to vector<32x256xf32>
      %35 = arith.addf %32, %34 : vector<32x256xf32>
      %c0_23 = arith.constant 0 : index
      %c0_24 = arith.constant 0 : index
      %36 = vector.load %arg11[%c0_23, %c0_24] : memref<32x256xf32, #tpu.memory_space<vmem>>, vector<32x256xf32>
      tpu.vector_store %arg11[%c0_23, %c0_24], %35 {strides = array<i32>} : memref<32x256xf32, #tpu.memory_space<vmem>>, vector<32x256xf32>,
    } else {
    }
    return
  }
  func.func @transform_0(%arg0: i32, %arg1: i32, %arg2: i32, %arg3: memref<3xi32, #tpu.memory_space<smem>>, %arg4: memref<3xi32, #tpu.memory_space<smem>>) -> (i32, i32) {
    %c0_i32 = arith.constant 0 : i32
    return %arg0, %arg2 : i32, i32
  }
  func.func @transform_1(%arg0: i32, %arg1: i32, %arg2: i32, %arg3: memref<3xi32, #tpu.memory_space<smem>>, %arg4: memref<3xi32, #tpu.memory_space<smem>>) -> (i32, i32) {
    %0 = arith.index_cast %arg2 : i32 to index
    %1 = memref.load %arg4[%0] : memref<3xi32, #tpu.memory_space<smem>>
    %c0_i32 = arith.constant 0 : i32
    return %arg0, %1 : i32, i32
  }
  func.func @transform_2(%arg0: i32, %arg1: i32, %arg2: i32, %arg3: memref<3xi32, #tpu.memory_space<smem>>, %arg4: memref<3xi32, #tpu.memory_space<smem>>) -> (i32, i32) {
    %c0_i32 = arith.constant 0 : i32
    return %arg1, %arg2 : i32, i32
  }
  func.func @transform_3(%arg0: i32, %arg1: i32, %arg2: i32, %arg3: memref<3xi32, #tpu.memory_space<smem>>, %arg4: memref<3xi32, #tpu.memory_space<smem>>) -> (i32, i32) {
    %c0_i32 = arith.constant 0 : i32
    %c0_i32_0 = arith.constant 0 : i32
    return %arg0, %c0_i32 : i32, i32
  }
  func.func @transform_4(%arg0: i32, %arg1: i32, %arg2: i32, %arg3: memref<3xi32, #tpu.memory_space<smem>>, %arg4: memref<3xi32, #tpu.memory_space<smem>>) -> (i32, i32) {
    %c0_i32 = arith.constant 0 : i32
    %c0_i32_0 = arith.constant 0 : i32
    return %c0_i32, %arg1 : i32, i32
  }
  func.func @transform_5(%arg0: i32, %arg1: i32, %arg2: i32, %arg3: memref<3xi32, #tpu.memory_space<smem>>, %arg4: memref<3xi32, #tpu.memory_space<smem>>) -> (i32, i32) {
    %c0_i32 = arith.constant 0 : i32
    %c0_i32_0 = arith.constant 0 : i32
    return %c0_i32, %arg1 : i32, i32
  }
  func.func @transform_6(%arg0: i32, %arg1: i32, %arg2: i32, %arg3: memref<3xi32, #tpu.memory_space<smem>>, %arg4: memref<3xi32, #tpu.memory_space<smem>>) -> (i32, i32) {
    %c0_i32 = arith.constant 0 : i32
    return %arg0, %arg1 : i32, i32
  }
}

</mosaic_0001>

<bundles_post_ra>
// kernel: tpu_custom_call.1
= control target key start
LH: loop header
LB: loop body
LE: loop exit
PB: predicated region body
PF: predicated region fallthrough
CT: control target
= control target key end

     0   :  { %s2438_s0 = inlined_call_operand.vmem [shape: s32[3], index: 0, kind: input, shape index: {}]   ;;  %s2439_s2 = inlined_call_operand.hbm [shape: s8[32,768], index: 2, kind: input, shape index: {}]   ;;  %s2440_s3 = inlined_call_operand.hbm [shape: bf16[32,768], index: 3, kind: input, shape index: {}]   ;;  %s2441_s4 = inlined_call_operand.hbm [shape: s8[512,768], index: 4, kind: input, shape index: {}]   ;;  %s2442_s5 = inlined_call_operand.vmem [shape: f32[32,1], index: 5, kind: input, shape index: {}]   ;;  %s2443_s6 = inlined_call_operand.vmem [shape: f32[1,512], index: 6, kind: input, shape index: {}]   ;;  %s2444_s7 = inlined_call_operand.vmem [shape: f32[1,512], index: 7, kind: input, shape index: {}]   ;;  %s2445_s8 = inlined_call_operand.hbm [shape: f32[32,512], index: 8, kind: output, shape index: {}]   ;;  %s2446_s1 = inlined_call_operand.vmem [shape: s32[3], index: 1, kind: input, shape index: {}]  }
   0x1   :  { %2462 = sst [smem:[#allocation32_spill]] %s2440_s3  ;;  %s13_s29 = sshll.u32 %s2438_s0, 4  ;;  %s14_s29 = int_to_ptr.vmem [resolvable:$true] %s13_s29 }
   0x2   :  { %2463 = sst [smem:[#allocation33_spill]] %s2442_s5  ;;  %s17_s10 = sshll.u32 %s2446_s1, 4  ;;  %s18_s10 = int_to_ptr.vmem [resolvable:$true] %s17_s10 }
   0x3   :  { %2464 = sst [smem:[#allocation34_spill]] %s2443_s6  ;;  %s1363_s11 = scalar_lea.vmem %s14_s29, 16 }
   0x4   :  { %2465 = sst [smem:[#allocation35_spill]] %s2444_s7  ;;  %p1364_p0 = scmp.ne.s32.totalorder %s14_s29, %s1363_s11 }
   0x5   :  { %2466 = sst [smem:[#allocation36_spill]] %s2445_s8  ;;  %p1368_p1 = scmp.lt.s32.totalorder %s14_s29, %s14_s29 }
   0x6   :  { %p1369_p2 = scmp.lt.s32.totalorder %s1363_s11, %s1363_s11 }
   0x8   :  { %p1370_p3 = por %p1369_p2, %p1368_p1 }
   0xa   :  { %p1371_p4 = pnand %p1370_p3, %p1364_p0 }
   0xc   :  { %1374 = shalt.err (!%p1371_p4)  }
   0xd   :  { %s1659_s12 = smov [#allocation5]   ;;  %s1375_s13 = scalar_lea.vmem %s18_s10, 16 }
   0xe   :  { %16 = dma.vmem_to_smem %s14_s29, 16, %s1659_s12, [#allocation4] }
   0xf   :  { %p1376_p5 = scmp.ne.s32.totalorder %s18_s10, %s1375_s13  ;;  %p1380_p6 = scmp.lt.s32.totalorder %s18_s10, %s18_s10 }
  0x10   :  { %p1381_p7 = scmp.lt.s32.totalorder %s1375_s13, %s1375_s13 }
  0x12   :  { %p1382_p8 = por %p1381_p7, %p1380_p6 }
  0x14   :  { %p1383_p9 = pnand %p1382_p8, %p1376_p5 }
  0x16   :  { %1386 = shalt.err (!%p1383_p9)  }
  0x17   :  { %s1660_s0 = smov [#allocation6]  }
  0x18   :  { %20 = dma.vmem_to_smem %s18_s10, 16, %s1660_s0, [#allocation4] }
  0x19   :  { %1573 = dma.done.wait [#allocation4], 32 }
  0x1a   :  { %1574 = vsyncadd [#allocation4], 4294967264 }
  0x1b   :  { %22 = sfence }
  0x1c   :  { %23 = vsyncpa [#allocation8], 0 }
  0x1d   :  { %25 = vsyncpa [#allocation8 + $0x1], 0 }
  0x1e   :  { %26 = vsyncpa [#allocation11], 0 }
  0x1f   :  { %28 = vsyncpa [#allocation11 + $0x1], 0 }
  0x20   :  { %29 = vsyncpa [#allocation9], 0 }
  0x21   :  { %31 = vsyncpa [#allocation9 + $0x1], 0  ;;  %s1728_s1 = smov 0   ;;  %s1730_s14 = smov 0  }
  0x22   :  { %s1732_s15 = smov 0   ;;  %s1734_s16 = smov 0  }
  0x23   :  { %s1736_s17 = smov 0   ;;  %s1738_s18 = smov 0  }
  0x24   :  { %s1740_s19 = smov 0   ;;  %s1742_s20 = smov 0  }
  0x25   :  { %s1744_s21 = smov 0   ;;  %s1746_s22 = smov 0  }
  0x26   :  { %s1748_s23 = smov 0   ;;  %s1750_s24 = smov 0  }
  0x27   :  { %s1752_s25 = smov 0   ;;  %s1754_s26 = smov 0  }
  0x28   :  { %s1756_s27 = smov 0   ;;  %s1758_s28 = smov 0  }
  0x29   :  { %s1760_s29 = smov 0  }
  0x2a LB: > { %2467 = sst [smem:[#allocation21_spill]] %s1593_s1  ;;  %p2450_p10 = scmp.eq.s32.totalorder %s1657_s29, 0  ;;  %s1657_s29 = sphi %s1760_s29, %s37_s29   ;;  %s1653_s28 = sphi %s1758_s28, %s2540_s28   ;;  %s1649_s27 = sphi %s1756_s27, %s2539_s27   ;;  %s1645_s26 = sphi %s1754_s26, %s2538_s26   ;;  %s1641_s25 = sphi %s1752_s25, %s2537_s25   ;;  %s1637_s24 = sphi %s1750_s24, %s2524_s24   ;;  %s1633_s23 = sphi %s1748_s23, %s2536_s23   ;;  %s1629_s22 = sphi %s1746_s22, %s2535_s22   ;;  %s1625_s21 = sphi %s1744_s21, %s2534_s21   ;;  %s1621_s20 = sphi %s1742_s20, %s2533_s20   ;;  %s1617_s19 = sphi %s1740_s19, %s2532_s19   ;;  %s1613_s18 = sphi %s1738_s18, %s2531_s18   ;;  %s1609_s17 = sphi %s1736_s17, %s2530_s17   ;;  %s1605_s16 = sphi %s1734_s16, %s2529_s16   ;;  %s1601_s15 = sphi %s1732_s15, %s2521_s15   ;;  %s1597_s14 = sphi %s1730_s14, %s2528_s14   ;;  %s1593_s1 = sphi %s1728_s1, %s2527_s1  }
  0x2b   : > { %2468 = sst [smem:[#allocation22_spill]] %s1601_s15  ;;  %p102_p11 = scmp.ne.s32.totalorder %s1625_s21, %s1621_s20 }
  0x2c   : > { %2469 = sst [smem:[#allocation23_spill]] %s1637_s24  ;;  %p2449_p13 = scmp.lt.s32.totalorder %s1657_s29, 6 }
  0x2d   : > { %2470 = sst [smem:[#allocation24_spill]] %s1641_s25  ;;  %p104_p0 = por %p102_p11, %p2450_p10 }
  0x2e   : > { %2471 = sst [smem:[#allocation25_spill]] %s1645_s26  ;;  %s296_s9 = sand.u32 1, %s1657_s29  }
  0x2f   : > { %s298_s10 = sand.u32 1, %s1625_s21   ;;  %p1826_p1 = pnand %p2449_p13, %p104_p0 }
  0x30   : > { %s1066_s11 = sshll.u32 %s298_s10, 5  ;;  %p1074_p2 = scmp.ge.s32.totalorder %s1657_s29, 1 }
  0x31   : > { %s1178_s13 = scalar_select %p104_p0, [#allocation6], [#allocation14] }
  0x32   : > { %s1179_s0 = scalar_select %p104_p0, %s1649_s27, 0 }
  0x33   : > { %s2542_s13 = smov (!%p2449_p13, %s1178_s13), [#allocation15]  ;;  %s300_s30 = scalar_lea.vmem [#allocation10], %s1066_s11 }
  0x34   : > { %s2544_s0 = smov (!%p2449_p13, %s1179_s0), 0  ;;  %s311_s8 = sshll.u32 %s300_s30, 4  ;;  %s1835_s8 = int_to_ptr.vmem [resolvable:$true] %s311_s8 }
  0x35   : > { %s301_s5 = sld [smem:[%s2542_s13 + %s2544_s0]]  ;;  %p359_p3 = scmp.lt.s32.totalorder %s1657_s29, 7 }
  0x36   : > { %s2474_s3 = sld [smem:[#allocation32_spill]]  ;;  %s1848_s30 = scalar_lea.sflag [#allocation11], %s296_s9 }
  0x37   : > { %p1839_p4 = pnand %p1074_p2, %p359_p3  ;;  %p1389_p6 = pneg %p1826_p1 }
  0x39   : > { %s2473_s10 = scalar_select %p1839_p4, 1, 0 }
  0x3b   : > { %s1094_s25 = sshll.u32 %s301_s5, 7 }
  0x3c   : > { %s1846_s26 = scalar_lea.hbm %s2474_s3, %s1094_s25  ;;  %s1392_s6 = scalar_lea.hbm %s2474_s3, 1536 }
  0x3d   : > { %s1387_s11 = scalar_lea.hbm %s1846_s26, 512  ;;  %p1393_p9 = scmp.lt.u32.totalorder %s1846_s26, %s2474_s3 }
  0x3e   : > { %p1388_p5 = scmp.ne.s32.totalorder %s1846_s26, %s1387_s11  ;;  %p1394_p11 = scmp.lt.u32.totalorder %s1392_s6, %s1387_s11 }
  0x3f   : > { %p1396_p2 = scmp.lt.u32.totalorder %s1387_s11, %s1846_s26 }
  0x40   : > { %p1390_p7 = pnand %p1389_p6, %p1388_p5  ;;  %p1395_p0 = por %p1394_p11, %p1393_p9 }
  0x42   : > { %p1391_p8 = pneg %p1390_p7  ;;  %p1397_p3 = por %p1396_p2, %p1395_p0 }
  0x44   : > { %p1398_p13 = pnand %p1397_p3, %p1391_p8 }
  0x46   : > { %1401 = shalt.err (!%p1398_p13)
}
  0x47   : > { %s1402_s9 = scalar_lea.vmem %s1835_s8, 512  ;;  %s1661_s0 = smov [#allocation10]  }
  0x48   : > { %p1403_p5 = scmp.ne.s32.totalorder %s1835_s8, %s1402_s9  ;;  %s1407_s5 = sshll.u32 %s1661_s0, 4  ;;  %s1408_s5 = int_to_ptr.vmem [resolvable:$false] %s1407_s5 }
  0x49   : > { %s1409_s13 = scalar_lea.vmem %s1408_s5, 1024  ;;  %p1410_p10 = scmp.lt.s32.totalorder %s1835_s8, %s1408_s5 }
  0x4a   : > { %p1405_p7 = pnand %p1403_p5, %p1389_p6  ;;  %p1411_p9 = scmp.lt.s32.totalorder %s1409_s13, %s1402_s9 }
  0x4c   : > { %p1406_p12 = pneg %p1405_p7  ;;  %p1412_p11 = por %p1411_p9, %p1410_p10 }
  0x4e   : > { %p1413_p0 = pnand %p1412_p11, %p1406_p12 }
  0x50   : > { %1416 = shalt.err (!%p1413_p0)
}
  0x51   : > { %s1662_s11 = smov 384   ;;  %s1663_s6 = smov 128  }
  0x52   : > { %s1664_s7 = smov 8   ;;  %s1877_s25 = sadd.s32 4294967295, %s1657_s29  }
  0x53   : > { %1195 = dma.hbm_to_vmem [thread:$0]  (!%p1826_p1), %s1846_s26, 512, %s1835_s8, %s1848_s30, %s1662_s11, %s1663_s6, %s1664_s7  }
  0x54   : > { %s49_s0 = sadd.s32 1, %s1649_s27  ;;  %s52_s5 = sadd.s32 1, %s1653_s28 }
  0x55   : > { %p50_p10 = scmp.ge.s32.totalorder %s49_s0, 3  ;;  %s65_s13 = sadd.s32 1, %s1637_s24 }
  0x56   : > { %p72_p12 = scmp.ne.s32.totalorder %s1637_s24, %s1633_s23  ;;  %p2476_p13 = scmp.eq.s32.totalorder %s1657_s29, 0 }
  0x57   : > { %s2546_s0 = smov (%p50_p10, %s49_s0), 0  ;;  %s2548_s5 = smov (!%p50_p10, %s52_s5), %s1653_s28 }
  0x58   : > { %2475 = sst [smem:[#allocation26_spill]] %s2546_s0  ;;  %s61_s8 = ssub.s32 %s1649_s27, %s2546_s0 }
  0x59   : > { %p1892_p1 = por %p2476_p13, %p72_p12  ;;  %p54_p6 = scmp.ge.s32.totalorder %s2548_s5, 2 }
  0x5a   : > { %p63_p8 = scmp.eq.s32.totalorder %s61_s8, 0  ;;  %p78_p2 = scmp.ne.s32.totalorder %s1633_s23, %s1629_s22 }
  0x5b   : > { %p79_p3 = scmp.eq.s32.totalorder %s1877_s25, 0  ;;  %s2550_s5 = smov (%p54_p6, %s2548_s5), 0 }
  0x5c   : > { %2478 = sst [smem:[#allocation27_spill]] %s2550_s5  ;;  %p2481_p7 = scmp.ne.s32.totalorder %s1621_s20, %s1617_s19 }
  0x5d   : > { %s1902_s12 = scalar_select %p63_p8, %s1637_s24, %s65_s13  }
  0x5e   : > { %p1904_p5 = por %p79_p3, %p78_p2  ;;  %s88_s6 = sld [smem:[#allocation6 + %s1649_s27]] }
  0x5f   : > { %2479 = sst [smem:[#allocation28_spill]] %s1902_s12  ;;  %p1913_p9 = por %p2481_p7, %p79_p3 }
  0x60   : > { %s2480_s11 = scalar_select %p1904_p5, 1, 0 }
  0x61   : > { %s89_s7 = sld [smem:[#allocation6 + %s2546_s0]]  ;;  %s118_s9 = ssub.s32 %s1653_s28, %s2550_s5 }
  0x62   : > { %s2482_s22 = scalar_select %p1913_p9, 1, 0 }
  0x63   : > { %p136_p11 = scmp.ne.s32.totalorder %s1609_s17, %s1605_s16  ;;  %s120_s13 = sor.u32 %s118_s9, %s61_s8 }
  0x64   : > { %p227_p0 = scmp.eq.s32.totalorder %s118_s9, 0  ;;  %p1921_p10 = scmp.eq.s32.totalorder %s120_s13, 0 }
  0x65   : > { %p1925_p12 = por %p136_p11, %p79_p3  ;;  %s229_s19 = sadd.s32 1, %s1601_s15 }
  0x66   : > { %p239_p13 = scmp.ne.s32.totalorder %s1601_s15, %s1597_s14  ;;  %p240_p6 = scmp.eq.s32.totalorder %s1877_s25, 5 }
  0x67   : > { %s2484_s0 = scalar_select %p1925_p12, 1, 0 }
  0x68   : > { %s1933_s12 = scalar_select %p227_p0, %s1601_s15, %s229_s19  }
  0x69   : > { %2485 = sst [smem:[#allocation29_spill]] %s2484_s0  ;;  %s91_s5 = ssub.s32 %s88_s6, %s89_s7 }
  0x6a   : > { %2486 = sst [smem:[#allocation30_spill]] %s1933_s12  ;;  %p93_p8 = scmp.eq.s32.totalorder %s91_s5, 0 }
  0x6b   : > { %p245_p2 = scmp.ne.s32.totalorder %s1597_s14, %s1593_s1  ;;  %p1938_p7 = por %p240_p6, %p239_p13 }
  0x6c   : > { %s2488_s9 = sadd.s32 4294967294, %s1657_s29   ;;  %s2489_s8 = sadd.s32 1, %s1625_s21 }
  0x6d   : > { %s2487_s16 = scalar_select %p1938_p7, 1, 0 }
  0x6e   : > { %p246_p3 = scmp.eq.s32.totalorder %s2488_s9, 5  ;;  %s275_s19 = sand.u32 1, %s1637_s24  }
  0x6f   : > { %s1947_s13 = scalar_select %p93_p8, %s1625_s21, %s2489_s8  }
  0x70   : > { %p1949_p11 = por %p246_p3, %p245_p2  ;;  %s1063_s12 = sshll.u32 %s275_s19, 4 }
  0x71   : > { %2490 = sst [smem:[#allocation31_spill]] %s1947_s13  ;;  %s1093_s6 = sshll.u32 %s1649_s27, 8 }
  0x72   : > { %s2491_s0 = scalar_select %p1949_p11, 1, 0 }
  0x73   : > { %s1958_s5 = scalar_lea.hbm %s2439_s2, %s1093_s6  ;;  %s279_s9 = scalar_lea.vmem [#allocation7], %s1063_s12 }
  0x74   : > { %s289_s1 = sshll.u32 %s279_s9, 4  ;;  %p2492_p0 = scmp.lt.s32.totalorder %s1657_s29, 6  ;;  %s1960_s1 = int_to_ptr.vmem [resolvable:$true] %s289_s1 }
  0x75   : > { %s1071_s24 = sshll.u32 %s1649_s27, 1  ;;  %s276_s15 = scalar_lea.sflag [#allocation8], %s275_s19 }
  0x76   : > { %p1966_p13 = pnand %p2492_p0, %p1892_p1  ;;  %s1417_s6 = scalar_lea.hbm %s1958_s5, 256 }
  0x77   : > { %p1418_p6 = scmp.ne.s32.totalorder %s1958_s5, %s1417_s6  ;;  %s1422_s26 = scalar_lea.hbm %s2439_s2, 768 }
  0x78   : > { %p1419_p8 = pneg %p1966_p13  ;;  %p1423_p1 = scmp.lt.u32.totalorder %s1958_s5, %s2439_s2 }
  0x79   : > { %p1424_p0 = scmp.lt.u32.totalorder %s1422_s26, %s1417_s6  ;;  %p1426_p7 = scmp.lt.u32.totalorder %s1417_s6, %s1958_s5 }
  0x7a   : > { %p1420_p2 = pnand %p1419_p8, %p1418_p6 }
  0x7b   : > { %p1425_p11 = por %p1424_p0, %p1423_p1 }
  0x7c   : > { %p1421_p3 = pneg %p1420_p2 }
  0x7d   : > { %p1427_p12 = por %p1426_p7, %p1425_p11 }
  0x7f   : > { %p1428_p9 = pnand %p1427_p12, %p1421_p3 }
  0x81   : > { %1431 = shalt.err (!%p1428_p9)
}
  0x82   : > { %s1432_s19 = scalar_lea.vmem %s1960_s1, 256  ;;  %s1665_s12 = smov [#allocation7]  }
  0x83   : > { %p1433_p6 = scmp.ne.s32.totalorder %s1960_s1, %s1432_s19  ;;  %s1437_s7 = sshll.u32 %s1665_s12, 4  ;;  %s1438_s7 = int_to_ptr.vmem [resolvable:$false] %s1437_s7 }
  0x84   : > { %s1439_s13 = scalar_lea.vmem %s1438_s7, 512  ;;  %p1440_p4 = scmp.lt.s32.totalorder %s1960_s1, %s1438_s7 }
  0x85   : > { %p1435_p2 = pnand %p1433_p6, %p1419_p8  ;;  %p1441_p1 = scmp.lt.s32.totalorder %s1439_s13, %s1432_s19 }
  0x87   : > { %p1436_p5 = pneg %p1435_p2  ;;  %p1442_p0 = por %p1441_p1, %p1440_p4 }
  0x89   : > { %p1443_p7 = pnand %p1442_p0, %p1436_p5 }
  0x8b   : > { %1446 = shalt.err (!%p1443_p7)
}
  0x8c   : > { %1190 = dma.hbm_to_vmem [thread:$0]  (!%p1966_p13), %s1958_s5, 256, %s1960_s1, %s276_s15  }
  0x8d   : > { %s123_s6 = sadd.s32 1, %s1613_s18  ;;  %p130_p9 = scmp.ne.s32.totalorder %s1613_s18, %s1609_s17 }
  0x8e   : > { %s2002_s26 = scalar_select %p1921_p10, %s1613_s18, %s123_s6  }
  0x8f   : > { %p2494_p4 = scmp.eq.s32.totalorder %s1657_s29, 0  ;;  %s323_s8 = sand.u32 1, %s1613_s18  }
  0x90   : > { %s1069_s9 = sshll.u32 %s323_s8, 7  ;;  %s1160_s19 = smul.u32 48, %s1653_s28 }
  0x91   : > { %p132_p5 = por %p130_p9, %p2494_p4  ;;  %p2495_p12 = scmp.lt.s32.totalorder %s1657_s29, 6 }
  0x92   : > { %s332_s7 = sadd.s32 %s1160_s19, %s1071_s24  ;;  %s325_s1 = scalar_lea.vmem [#allocation12], %s1069_s9 }
  0x93   : > { %p2010_p11 = pnand %p2495_p12, %p132_p5  ;;  %s335_s5 = sshll.u32 %s325_s1, 4  ;;  %s2016_s5 = int_to_ptr.vmem [resolvable:$true] %s335_s5 }
  0x94   : > { %s1073_s15 = sshll.u32 %s332_s7, 7  ;;  %s1452_s19 = scalar_lea.hbm %s2441_s4, 12288 }
  0x95   : > { %s2021_s6 = scalar_lea.hbm %s2441_s4, %s1073_s15  ;;  %p1449_p13 = pneg %p2010_p11 }
  0x96   : > { %s1447_s8 = scalar_lea.hbm %s2021_s6, 2048  ;;  %p1453_p6 = scmp.lt.u32.totalorder %s2021_s6, %s2441_s4 }
  0x97   : > { %p1448_p10 = scmp.ne.s32.totalorder %s2021_s6, %s1447_s8  ;;  %p1454_p2 = scmp.lt.u32.totalorder %s1452_s19, %s1447_s8 }
  0x98   : > { %p1456_p0 = scmp.lt.u32.totalorder %s1447_s8, %s2021_s6 }
  0x99   : > { %p1450_p8 = pnand %p1449_p13, %p1448_p10  ;;  %p1455_p1 = por %p1454_p2, %p1453_p6 }
  0x9b   : > { %p1451_p3 = pneg %p1450_p8  ;;  %p1457_p7 = por %p1456_p0, %p1455_p1 }
  0x9d   : > { %p1458_p9 = pnand %p1457_p7, %p1451_p3 }
  0x9f   : > { %1461 = shalt.err (!%p1458_p9)
}
  0xa0   : > { %s1462_s15 = scalar_lea.vmem %s2016_s5, 2048  ;;  %s1666_s3 = smov [#allocation12]  }
  0xa1   : > { %p1463_p4 = scmp.ne.s32.totalorder %s2016_s5, %s1462_s15  ;;  %s1467_s13 = sshll.u32 %s1666_s3, 4  ;;  %s1468_s13 = int_to_ptr.vmem [resolvable:$false] %s1467_s13 }
  0xa2   : > { %s1469_s24 = scalar_lea.vmem %s1468_s13, 4096  ;;  %p1470_p10 = scmp.lt.s32.totalorder %s2016_s5, %s1468_s13 }
  0xa3   : > { %p1465_p5 = pnand %p1463_p4, %p1449_p13  ;;  %p1471_p8 = scmp.lt.s32.totalorder %s1469_s24, %s1462_s15 }
  0xa5   : > { %p1466_p12 = pneg %p1465_p5  ;;  %p1472_p6 = por %p1471_p8, %p1470_p10 }
  0xa7   : > { %p1473_p2 = pnand %p1472_p6, %p1466_p12 }
  0xa9   : > { %1476 = shalt.err (!%p1473_p2)
}
  0xaa   : > { %s1667_s8 = smov 768   ;;  %s1668_s9 = smov 256  }
  0xab   : > { %s1669_s19 = smov 16   ;;  %p2497_p13 = scmp.ne.s32.totalorder %s2473_s10, 0 }
  0xac   : > { %1198 = dma.hbm_to_vmem [thread:$0]  (!%p2010_p11), %s2021_s6, 2048, %s2016_s5, %s1848_s30, %s1667_s8, %s1668_s9, %s1669_s19  }
  0xad   : > { %363 = sbr.rel (%p2497_p13) target bundleno = 966 (0x3c6), region = 44  ;;  %s365_s7 = sand.u32 (!%p2497_p13), 1, %s1633_s23  }
  0xae   : > { %s2052_s1 = sshll.u32 (!%p2497_p13), %s365_s7, 4  ;;  %s366_s15 = scalar_lea.sflag (!%p2497_p13), [#allocation8], %s365_s7 }
  0xaf   : > { %p2498_p3 = scmp.ne.s32.totalorder (!%p2497_p13), %s2480_s11, 0 }
  0xb4   : > { %1576 = dma.done.wait (%p2498_p3), %s366_s15, 256  }
  0xb5   : > { %1578 = vsyncadd (%p2498_p3), %s366_s15, 4294967040  ;;  %s374_s30 = sand.u32 1, %s1877_s25   ;;  %s376_s12 = sand.u32 1, %s1621_s20  }
  0xb6   : > { %s1076_s10 = sshll.u32 %s376_s12, 5  ;;  %s375_s5 = scalar_lea.sflag [#allocation11], %s374_s30 }
  0xb7   : > { %s2061_s6 = scalar_lea.vmem [#allocation10], %s1076_s10  ;;  %p2499_p11 = scmp.ne.s32.totalorder %s2482_s22, 0 }
  0xb9   : > { %1580 = dma.done.wait (%p2499_p11), %s375_s5, 512  }
  0xba   : > { %1582 = vsyncadd (%p2499_p11), %s375_s5, 4294966784  ;;  %s2500_s13 = sld [smem:[#allocation29_spill]]  ;;  %s385_s24 = sand.u32 1, %s1609_s17  }
  0xbb   : > { %s1077_s8 = sshll.u32 %s385_s24, 7 }
  0xbc   : > { %s2068_s11 = scalar_lea.vmem [#allocation12], %s1077_s8 }
  0xc0   : > { %p2501_p1 = scmp.ne.s32.totalorder %s2500_s13, 0 }
  0xc2   : > { %1584 = dma.done.wait (%p2501_p1), %s375_s5, 2048  }
  0xc3   : > { %1586 = vsyncadd (%p2501_p1), %s375_s5, 4294965248  ;;  %s2502_s25 = sld [smem:[#allocation25_spill]]  ;;  %s436_s9 = sand.u32 1, %s1597_s14  }
  0xc4   : > { %s1078_s7 = sshll.u32 %s436_s9, 6  ;;  %s2503_s30 = sld [smem:[#allocation34_spill]] }
  0xc5   : > { %s2504_s13 = sld [smem:[#allocation35_spill]]  ;;  %s2088_s8 = scalar_lea.vmem [#allocation13], %s1078_s7 }
  0xc6   : > { %s2505_s3 = sld [smem:[#allocation24_spill]] }
  0xc9   : > { %s1079_s19 = sshll.u32 %s2502_s25, 1 }
  0xca   : > { %p452_p0 = scmp.lt.s32.totalorder %s1079_s19, 3 }
  0xcc   : > { %s2552_s19 = smov (!%p452_p0, %s1079_s19), 3  ;;  %p1081_p7 = scmp.ne.s32.totalorder %s2505_s3, 0 }
  0xcd   : > { %s454_s12 = scalar_lea.vmem %s2503_s30, %s2552_s19  ;;  %s459_s5 = scalar_lea.vmem %s2504_s13, %s2552_s19  ;;  %v1670_v0 = vmov (!%p1081_p7), 0   ;;  %v1671_v1 = vmov (!%p1081_p7), 0.0  }
  0xce   : > { %466 = sbr.rel (%p1081_p7) target bundleno = 214 (0xd6), region = 60  ;;  %467 = vst [vmem:[#allocation2] sm:$0xff] (!%p1081_p7), %v1670_v0  ;;  %468 = vst [vmem:[#allocation2 + $0x8] sm:$0xff] (!%p1081_p7), %v1670_v0 }
  0xcf   : > { %469 = vst [vmem:[#allocation2 + $0x10] sm:$0xff] (!%p1081_p7), %v1670_v0  ;;  %470 = vst [vmem:[#allocation2 + $0x18] sm:$0xff] (!%p1081_p7), %v1670_v0 }
  0xd0   : > { %471 = vst [vmem:[#allocation2 + $0x20] sm:$0xff] (!%p1081_p7), %v1670_v0  ;;  %472 = vst [vmem:[#allocation2 + $0x28] sm:$0xff] (!%p1081_p7), %v1670_v0 }
  0xd1   : > { %473 = vst [vmem:[#allocation2 + $0x30] sm:$0xff] (!%p1081_p7), %v1670_v0  ;;  %474 = vst [vmem:[#allocation2 + $0x38] sm:$0xff] (!%p1081_p7), %v1670_v0 }
  0xd2   : > { %475 = vst [vmem:[#allocation3] sm:$0xff] (!%p1081_p7), %v1671_v1  ;;  %476 = vst [vmem:[#allocation3 + $0x8] sm:$0xff] (!%p1081_p7), %v1671_v1 }
  0xd3   : > { %477 = vst [vmem:[#allocation3 + $0x10] sm:$0xff] (!%p1081_p7), %v1671_v1  ;;  %478 = vst [vmem:[#allocation3 + $0x18] sm:$0xff] (!%p1081_p7), %v1671_v1 }
  0xd4   : > { %479 = vst [vmem:[#allocation3 + $0x20] sm:$0xff] (!%p1081_p7), %v1671_v1  ;;  %480 = vst [vmem:[#allocation3 + $0x28] sm:$0xff] (!%p1081_p7), %v1671_v1 }
  0xd5   : > { %481 = vst [vmem:[#allocation3 + $0x30] sm:$0xff] %v1671_v1  ;;  %482 = vst [vmem:[#allocation3 + $0x38] sm:$0xff] %v1671_v1 }
  0xd6 PF: > { %v484_v2 = vld [vmem:[%s2068_s11 + $0x8] sm:$0xff]  ;;  %v483_v3 = vld [vmem:[%s2068_s11] sm:$0xff]  ;;  %v486_v7 = vld [vmem:[%s2068_s11 + $0x18] sm:$0xff]  ;;  %s2506_s3 = scalar_lea.vmem [#allocation7], %s2052_s1  ;;  %s2507_s25 = sld [smem:[#allocation24_spill]] }
  0xd7   : > { %v2093_v4 = vunpack.c.l.s8.bf16 %v484_v2  ;;  %v2095_v5 = vunpack.c.h.s8.bf16 %v484_v2  ;;  %v2097_v6 = vunpack.c.l.s8.bf16 %v483_v3  ;;  %v508_v8 = vld [vmem:[%s2506_s3 + $0x8] sm:$0xff]  ;;  %v2108_v9 = vunpack.c.h.s8.bf16 %v483_v3  ;;  %v485_v13 = vld [vmem:[%s2068_s11 + $0x10] sm:$0xff]  ;;  %v487_v19 = vld [vmem:[%s2068_s11 + $0x20] sm:$0xff]  ;;  %s2508_s7 = smov %s2506_s3 }
  0xd8   : > { %v2110_v10 = vunpack.c.l.s8.bf16 %v486_v7  ;;  %v510_v11 = vunpack.c.l.s8.bf16 %v508_v8  ;;  %v512_v12 = vunpack.c.h.s8.bf16 %v508_v8  ;;  %v2117_v14 = vunpack.c.l.s8.bf16 %v485_v13  ;;  %v488_v16 = vld [vmem:[%s2068_s11 + $0x28] sm:$0xff]  ;;  %v490_v22 = vld [vmem:[%s2068_s11 + $0x38] sm:$0xff]  ;;  %v489_v25 = vld [vmem:[%s2068_s11 + $0x30] sm:$0xff] }
  0xd9   : > { %546 = vmatprep.subr.bf16.mxu0 %v2093_v4  ;;  %1096 = vmatprep.subr.bf16.mxu1 %v2093_v4  ;;  %v2119_v15 = vunpack.c.h.s8.bf16 %v486_v7  ;;  %v2126_v17 = vunpack.c.h.s8.bf16 %v485_v13  ;;  %v2128_v18 = vunpack.c.l.s8.bf16 %v488_v16  ;;  %v2135_v20 = vunpack.c.l.s8.bf16 %v487_v19  ;;  %v492_v28 = vld [vmem:[%s2068_s11 + $0x48] sm:$0xff]  ;;  %v491_v31 = vld [vmem:[%s2068_s11 + $0x40] sm:$0xff]  ;;  %v494_v34 = vld [vmem:[%s2068_s11 + $0x58] sm:$0xff] }
  0xda   : > { %547 = vmatpush1.bf16.xpose.msra.mxu0 %v2097_v6  ;;  %1112 = vmatpush1.bf16.xpose.msra.mxu1 %v2097_v6  ;;  %v2137_v21 = vunpack.c.h.s8.bf16 %v488_v16  ;;  %v2144_v23 = vunpack.c.h.s8.bf16 %v487_v19  ;;  %v2146_v24 = vunpack.c.l.s8.bf16 %v490_v22  ;;  %v2153_v26 = vunpack.c.l.s8.bf16 %v489_v25  ;;  %v493_v37 = vld [vmem:[%s2068_s11 + $0x50] sm:$0xff]  ;;  %v496_v40 = vld [vmem:[%s2068_s11 + $0x68] sm:$0xff]  ;;  %v495_v43 = vld [vmem:[%s2068_s11 + $0x60] sm:$0xff] }
  0xdb   : > { %548 = vmatprep.subr.bf16.mxu0 %v2095_v5  ;;  %1097 = vmatprep.subr.bf16.mxu1 %v2095_v5  ;;  %v2155_v27 = vunpack.c.h.s8.bf16 %v490_v22  ;;  %v2162_v29 = vunpack.c.h.s8.bf16 %v489_v25  ;;  %v2164_v30 = vunpack.c.l.s8.bf16 %v492_v28  ;;  %v2171_v32 = vunpack.c.l.s8.bf16 %v491_v31  ;;  %v498_v46 = vld [vmem:[%s2068_s11 + $0x78] sm:$0xff]  ;;  %v497_v49 = vld [vmem:[%s2068_s11 + $0x70] sm:$0xff]  ;;  %v507_v53 = vld [vmem:[%s2508_s7] sm:$0xff] }
  0xdc   : > { %578 = vmatprep.mubr.bf16.mxu0 %v510_v11  ;;  %588 = vmatprep.mubr.bf16.mxu1 %v512_v12  ;;  %v2173_v33 = vunpack.c.h.s8.bf16 %v492_v28  ;;  %v2180_v35 = vunpack.c.h.s8.bf16 %v491_v31  ;;  %v2182_v36 = vunpack.c.l.s8.bf16 %v494_v34  ;;  %v2189_v38 = vunpack.c.l.s8.bf16 %v493_v37  ;;  %s2240_s11 = sld [smem:[#allocation5 + %s2507_s25]]  ;;  %v499_v62 = vld [vmem:[#allocation2] sm:$0xff]  ;;  %v500_v11 = vld [vmem:[#allocation2 + $0x8] sm:$0xff]  ;;  %v501_v31 = vld [vmem:[#allocation2 + $0x10] sm:$0xff] }
  0xdd   : > { %v2191_v39 = vunpack.c.h.s8.bf16 %v494_v34  ;;  %v2198_v41 = vunpack.c.h.s8.bf16 %v493_v37  ;;  %v2200_v42 = vunpack.c.l.s8.bf16 %v496_v40  ;;  %v2207_v44 = vunpack.c.l.s8.bf16 %v495_v43  ;;  %v503_v63 = vld [vmem:[#allocation2 + $0x20] sm:$0xff]  ;;  %v504_v12 = vld [vmem:[#allocation2 + $0x28] sm:$0xff]  ;;  %v505_v34 = vld [vmem:[#allocation2 + $0x30] sm:$0xff] }
  0xde   : > { %v2209_v45 = vunpack.c.h.s8.bf16 %v496_v40  ;;  %v2216_v47 = vunpack.c.h.s8.bf16 %v495_v43  ;;  %v2218_v48 = vunpack.c.l.s8.bf16 %v498_v46  ;;  %v2225_v50 = vunpack.c.l.s8.bf16 %v497_v49 }
  0xdf   : > { %v2227_v51 = vunpack.c.h.s8.bf16 %v498_v46  ;;  %v2233_v52 = vunpack.c.h.s8.bf16 %v497_v49  ;;  %v509_v54 = vunpack.c.l.s8.bf16 %v507_v53  ;;  %v511_v55 = vunpack.c.h.s8.bf16 %v507_v53 }
  0xe2   : > { %549 = vmatpush1.bf16.xpose.msra.mxu0 %v2108_v9  ;;  %1113 = vmatpush1.bf16.xpose.msra.mxu1 %v2108_v9  ;;  %p1082_p9 = scmp.le.s32.totalorder %s2240_s11, 0 }
  0xe3   : > { %550 = vmatprep.subr.bf16.mxu0 %v2110_v10  ;;  %1098 = vmatprep.subr.bf16.mxu1 %v2110_v10 }
  0xea   : > { %551 = vmatpush1.bf16.xpose.msra.mxu0 %v2117_v14  ;;  %1114 = vmatpush1.bf16.xpose.msra.mxu1 %v2117_v14 }
  0xeb   : > { %552 = vmatprep.subr.bf16.mxu0 %v2119_v15  ;;  %1099 = vmatprep.subr.bf16.mxu1 %v2119_v15 }
  0xf2   : > { %553 = vmatpush1.bf16.xpose.msra.mxu0 %v2126_v17  ;;  %1115 = vmatpush1.bf16.xpose.msra.mxu1 %v2126_v17 }
  0xf3   : > { %554 = vmatprep.subr.bf16.mxu0 %v2128_v18  ;;  %1100 = vmatprep.subr.bf16.mxu1 %v2128_v18 }
  0xfa   : > { %555 = vmatpush1.bf16.xpose.msra.mxu0 %v2135_v20  ;;  %1116 = vmatpush1.bf16.xpose.msra.mxu1 %v2135_v20 }
  0xfb   : > { %556 = vmatprep.subr.bf16.mxu0 %v2137_v21  ;;  %1101 = vmatprep.subr.bf16.mxu1 %v2137_v21 }
 0x102   : > { %557 = vmatpush1.bf16.xpose.msra.mxu0 %v2144_v23  ;;  %1117 = vmatpush1.bf16.xpose.msra.mxu1 %v2144_v23 }
 0x103   : > { %558 = vmatprep.subr.bf16.mxu0 %v2146_v24  ;;  %1102 = vmatprep.subr.bf16.mxu1 %v2146_v24 }
 0x10a   : > { %559 = vmatpush1.bf16.xpose.msra.mxu0 %v2153_v26  ;;  %1118 = vmatpush1.bf16.xpose.msra.mxu1 %v2153_v26 }
 0x10b   : > { %560 = vmatprep.subr.bf16.mxu0 %v2155_v27  ;;  %1103 = vmatprep.subr.bf16.mxu1 %v2155_v27 }
 0x112   : > { %561 = vmatpush1.bf16.xpose.msra.mxu0 %v2162_v29  ;;  %1119 = vmatpush1.bf16.xpose.msra.mxu1 %v2162_v29 }
 0x113   : > { %562 = vmatprep.subr.bf16.mxu0 %v2164_v30  ;;  %1104 = vmatprep.subr.bf16.mxu1 %v2164_v30 }
 0x11a   : > { %563 = vmatpush1.bf16.xpose.msra.mxu0 %v2171_v32  ;;  %1120 = vmatpush1.bf16.xpose.msra.mxu1 %v2171_v32 }
 0x11b   : > { %564 = vmatprep.subr.bf16.mxu0 %v2173_v33  ;;  %1105 = vmatprep.subr.bf16.mxu1 %v2173_v33 }
 0x122   : > { %565 = vmatpush1.bf16.xpose.msra.mxu0 %v2180_v35  ;;  %1121 = vmatpush1.bf16.xpose.msra.mxu1 %v2180_v35 }
 0x123   : > { %566 = vmatprep.subr.bf16.mxu0 %v2182_v36  ;;  %1106 = vmatprep.subr.bf16.mxu1 %v2182_v36 }
 0x12a   : > { %567 = vmatpush1.bf16.xpose.msra.mxu0 %v2189_v38  ;;  %1122 = vmatpush1.bf16.xpose.msra.mxu1 %v2189_v38 }
 0x12b   : > { %568 = vmatprep.subr.bf16.mxu0 %v2191_v39  ;;  %1107 = vmatprep.subr.bf16.mxu1 %v2191_v39 }
 0x132   : > { %569 = vmatpush1.bf16.xpose.msra.mxu0 %v2198_v41  ;;  %1123 = vmatpush1.bf16.xpose.msra.mxu1 %v2198_v41 }
 0x133   : > { %570 = vmatprep.subr.bf16.mxu0 %v2200_v42  ;;  %1108 = vmatprep.subr.bf16.mxu1 %v2200_v42 }
 0x13a   : > { %571 = vmatpush1.bf16.xpose.msra.mxu0 %v2207_v44  ;;  %1124 = vmatpush1.bf16.xpose.msra.mxu1 %v2207_v44 }
 0x13b   : > { %572 = vmatprep.subr.bf16.mxu0 %v2209_v45  ;;  %1109 = vmatprep.subr.bf16.mxu1 %v2209_v45 }
 0x142   : > { %573 = vmatpush1.bf16.xpose.msra.mxu0 %v2216_v47  ;;  %1125 = vmatpush1.bf16.xpose.msra.mxu1 %v2216_v47 }
 0x143   : > { %574 = vmatprep.subr.bf16.mxu0 %v2218_v48  ;;  %1110 = vmatprep.subr.bf16.mxu1 %v2218_v48 }
 0x14a   : > { %575 = vmatpush1.bf16.xpose.msra.mxu0 %v2225_v50  ;;  %1126 = vmatpush1.bf16.xpose.msra.mxu1 %v2225_v50 }
 0x14b   : > { %576 = vmatprep.subr.bf16.mxu0 %v2227_v51  ;;  %1111 = vmatprep.subr.bf16.mxu1 %v2227_v51 }
 0x152   : > { %577 = vmatpush1.bf16.xpose.msra.mxu0 %v2233_v52  ;;  %1127 = vmatpush1.bf16.xpose.msra.mxu1 %v2233_v52 }
 0x153   : > { %660 = vmatprep.subr.bf16.mxu0 (!%p1082_p9), %v2093_v4  ;;  %1128 = vmatprep.subr.bf16.mxu1 (!%p1082_p9), %v2093_v4  ;;  %v1355_v4 = vld [vmem:[%s2061_s6] ss:$8 sps:$4 sm:$0xff] (!%p1082_p9)  }
 0x159   : > { %579 = vmatmul.mubr.bf16.vlgmr.msra.gmra.mrb[0].mxu0 %v509_v54  ;;  %589 = vmatmul.mubr.bf16.vlgmr.msra.gmra.mrb[0].mxu1 %v511_v55  ;;  %v502_v54 = vld [vmem:[#allocation2 + $0x18] sm:$0xff] }
 0x15a   : > { %v506_v55 = vld [vmem:[#allocation2 + $0x38] sm:$0xff]  ;;  %661 = vmatpush1.bf16.xpose.msra.mxu0 (!%p1082_p9), %v2097_v6  ;;  %1144 = vmatpush1.bf16.xpose.msra.mxu1 (!%p1082_p9), %v2097_v6  ;;  %v628_v6 = vld [vmem:[#allocation3] sm:$0xff] (!%p1082_p9) }
 0x15b   : > { %662 = vmatprep.subr.bf16.mxu0 (!%p1082_p9), %v2095_v5  ;;  %1129 = vmatprep.subr.bf16.mxu1 (!%p1082_p9), %v2095_v5  ;;  %v1358_v5 = vld [vmem:[%s2061_s6 + $0x10] ss:$8 sps:$4 sm:$0xff] (!%p1082_p9)  }
 0x162   : > { %663 = vmatpush1.bf16.xpose.msra.mxu0 (!%p1082_p9), %v2108_v9  ;;  %1145 = vmatpush1.bf16.xpose.msra.mxu1 (!%p1082_p9), %v2108_v9  ;;  %v632_v9 = vld [vmem:[#allocation3 + $0x20] sm:$0xff] (!%p1082_p9) }
 0x163   : > { %664 = vmatprep.subr.bf16.mxu0 (!%p1082_p9), %v2110_v10  ;;  %1130 = vmatprep.subr.bf16.mxu1 (!%p1082_p9), %v2110_v10  ;;  %v629_v10 = vld [vmem:[#allocation3 + $0x8] sm:$0xff] (!%p1082_p9) }
 0x16a   : > { %665 = vmatpush1.bf16.xpose.msra.mxu0 (!%p1082_p9), %v2117_v14  ;;  %1146 = vmatpush1.bf16.xpose.msra.mxu1 (!%p1082_p9), %v2117_v14  ;;  %v633_v14 = vld [vmem:[#allocation3 + $0x28] sm:$0xff] (!%p1082_p9) }
 0x16b   : > { %666 = vmatprep.subr.bf16.mxu0 (!%p1082_p9), %v2119_v15  ;;  %1131 = vmatprep.subr.bf16.mxu1 (!%p1082_p9), %v2119_v15 }
 0x172   : > { %667 = vmatpush1.bf16.xpose.msra.mxu0 (!%p1082_p9), %v2126_v17  ;;  %1147 = vmatpush1.bf16.xpose.msra.mxu1 (!%p1082_p9), %v2126_v17 }
 0x173   : > { %668 = vmatprep.subr.bf16.mxu0 (!%p1082_p9), %v2128_v18  ;;  %1132 = vmatprep.subr.bf16.mxu1 (!%p1082_p9), %v2128_v18  ;;  %v630_v18 = vld [vmem:[#allocation3 + $0x10] sm:$0xff] (!%p1082_p9) }
 0x17a   : > { %669 = vmatpush1.bf16.xpose.msra.mxu0 (!%p1082_p9), %v2135_v20  ;;  %1148 = vmatpush1.bf16.xpose.msra.mxu1 (!%p1082_p9), %v2135_v20  ;;  %v634_v20 = vld [vmem:[#allocation3 + $0x30] sm:$0xff] (!%p1082_p9) }
 0x17b   : > { %670 = vmatprep.subr.bf16.mxu0 (!%p1082_p9), %v2137_v21  ;;  %1133 = vmatprep.subr.bf16.mxu1 (!%p1082_p9), %v2137_v21 }
 0x182   : > { %671 = vmatpush1.bf16.xpose.msra.mxu0 (!%p1082_p9), %v2144_v23  ;;  %1149 = vmatpush1.bf16.xpose.msra.mxu1 (!%p1082_p9), %v2144_v23 }
 0x183   : > { %672 = vmatprep.subr.bf16.mxu0 (!%p1082_p9), %v2146_v24  ;;  %1134 = vmatprep.subr.bf16.mxu1 (!%p1082_p9), %v2146_v24 }
 0x18a   : > { %673 = vmatpush1.bf16.xpose.msra.mxu0 (!%p1082_p9), %v2153_v26  ;;  %1150 = vmatpush1.bf16.xpose.msra.mxu1 (!%p1082_p9), %v2153_v26 }
 0x18b   : > { %674 = vmatprep.subr.bf16.mxu0 (!%p1082_p9), %v2155_v27  ;;  %1135 = vmatprep.subr.bf16.mxu1 (!%p1082_p9), %v2155_v27  ;;  %v631_v27 = vld [vmem:[#allocation3 + $0x18] sm:$0xff] (!%p1082_p9) }
 0x192   : > { %675 = vmatpush1.bf16.xpose.msra.mxu0 (!%p1082_p9), %v2162_v29  ;;  %1151 = vmatpush1.bf16.xpose.msra.mxu1 (!%p1082_p9), %v2162_v29  ;;  %v635_v29 = vld [vmem:[#allocation3 + $0x38] sm:$0xff] (!%p1082_p9) }
 0x193   : > { %676 = vmatprep.subr.bf16.mxu0 (!%p1082_p9), %v2164_v30  ;;  %1136 = vmatprep.subr.bf16.mxu1 (!%p1082_p9), %v2164_v30 }
 0x19a   : > { %677 = vmatpush1.bf16.xpose.msra.mxu0 (!%p1082_p9), %v2171_v32  ;;  %1152 = vmatpush1.bf16.xpose.msra.mxu1 (!%p1082_p9), %v2171_v32 }
 0x19b   : > { %678 = vmatprep.subr.bf16.mxu0 (!%p1082_p9), %v2173_v33  ;;  %1137 = vmatprep.subr.bf16.mxu1 (!%p1082_p9), %v2173_v33 }
 0x1a2   : > { %679 = vmatpush1.bf16.xpose.msra.mxu0 (!%p1082_p9), %v2180_v35  ;;  %1153 = vmatpush1.bf16.xpose.msra.mxu1 (!%p1082_p9), %v2180_v35 }
 0x1a3   : > { %680 = vmatprep.subr.bf16.mxu0 (!%p1082_p9), %v2182_v36  ;;  %1138 = vmatprep.subr.bf16.mxu1 (!%p1082_p9), %v2182_v36 }
 0x1aa   : > { %681 = vmatpush1.bf16.xpose.msra.mxu0 (!%p1082_p9), %v2189_v38  ;;  %1154 = vmatpush1.bf16.xpose.msra.mxu1 (!%p1082_p9), %v2189_v38 }
 0x1ab   : > { %682 = vmatprep.subr.bf16.mxu0 (!%p1082_p9), %v2191_v39  ;;  %1139 = vmatprep.subr.bf16.mxu1 (!%p1082_p9), %v2191_v39 }
 0x1b2   : > { %683 = vmatpush1.bf16.xpose.msra.mxu0 (!%p1082_p9), %v2198_v41  ;;  %1155 = vmatpush1.bf16.xpose.msra.mxu1 (!%p1082_p9), %v2198_v41 }
 0x1b3   : > { %684 = vmatprep.subr.bf16.mxu0 (!%p1082_p9), %v2200_v42  ;;  %1140 = vmatprep.subr.bf16.mxu1 (!%p1082_p9), %v2200_v42 }
 0x1ba   : > { %685 = vmatpush1.bf16.xpose.msra.mxu0 (!%p1082_p9), %v2207_v44  ;;  %1156 = vmatpush1.bf16.xpose.msra.mxu1 (!%p1082_p9), %v2207_v44 }
 0x1bb   : > { %686 = vmatprep.subr.bf16.mxu0 (!%p1082_p9), %v2209_v45  ;;  %1141 = vmatprep.subr.bf16.mxu1 (!%p1082_p9), %v2209_v45 }
 0x1c2   : > { %687 = vmatpush1.bf16.xpose.msra.mxu0 (!%p1082_p9), %v2216_v47  ;;  %1157 = vmatpush1.bf16.xpose.msra.mxu1 (!%p1082_p9), %v2216_v47 }
 0x1c3   : > { %688 = vmatprep.subr.bf16.mxu0 (!%p1082_p9), %v2218_v48  ;;  %1142 = vmatprep.subr.bf16.mxu1 (!%p1082_p9), %v2218_v48 }
 0x1ca   : > { %689 = vmatpush1.bf16.xpose.msra.mxu0 (!%p1082_p9), %v2225_v50  ;;  %1158 = vmatpush1.bf16.xpose.msra.mxu1 (!%p1082_p9), %v2225_v50 }
 0x1cb   : > { %690 = vmatprep.subr.bf16.mxu0 (!%p1082_p9), %v2227_v51  ;;  %1143 = vmatprep.subr.bf16.mxu1 (!%p1082_p9), %v2227_v51 }
 0x1d2   : > { %691 = vmatpush1.bf16.xpose.msra.mxu0 (!%p1082_p9), %v2233_v52  ;;  %1159 = vmatpush1.bf16.xpose.msra.mxu1 (!%p1082_p9), %v2233_v52 }
 0x22c   : > { %v580_v56 = vpop.f32.mrb[0].mxu0  ;;  %v590_v57 = vpop.f32.mrb[0].mxu1 }
 0x22d   : > { %v1161_v58 = vtrunc.f32 %v580_v56  ;;  %v1169_v59 = vtrunc.f32 %v590_v57  ;;  %v582_v60 = vpop.f32.mrb[1].mxu0  ;;  %v592_v61 = vpop.f32.mrb[1].mxu1 }
 0x22e   : > { %v1163_v0 = vtrunc.f32 %v582_v60  ;;  %v1171_v1 = vtrunc.f32 %v592_v61  ;;  %v584_v2 = vpop.f32.mrb[2].mxu0  ;;  %v594_v3 = vpop.f32.mrb[2].mxu1 }
 0x22f   : > { %v1162_v7 = vcvt.f32.s32 %v1161_v58  ;;  %v1170_v8 = vcvt.f32.s32 %v1169_v59  ;;  %v1165_v13 = vtrunc.f32 %v584_v2  ;;  %v1173_v16 = vtrunc.f32 %v594_v3  ;;  %v586_v19 = vpop.f32.mrb[3].mxu0  ;;  %v596_v22 = vpop.f32.mrb[3].mxu1 }
 0x230   : > { %v1164_v25 = vcvt.f32.s32 %v1163_v0  ;;  %v1172_v28 = vcvt.f32.s32 %v1171_v1  ;;  %v1167_v37 = vtrunc.f32 %v586_v19  ;;  %v1175_v40 = vtrunc.f32 %v596_v22  ;;  %627 = sbr.rel (%p1082_p9) target bundleno = 781 (0x30d), region = 64 }
 0x231   : > { %v607_v43 = vadd.s32 %v1162_v7, %v499_v62  ;;  %v611_v46 = vadd.s32 %v1170_v8, %v503_v63  ;;  %v1166_v49 = vcvt.f32.s32 %v1165_v13  ;;  %v1174_v53 = vcvt.f32.s32 %v1173_v16  ;;  %v1357_v62 = vld [vmem:[%s2061_s6 + $0x4] ss:$8 sps:$4 sm:$0xff] (!%p1082_p9)   ;;  %v1360_v63 = vld [vmem:[%s2061_s6 + $0x14] ss:$8 sps:$4 sm:$0xff] (!%p1082_p9)  }
 0x232   : > { %v608_v56 = vadd.s32 %v1164_v25, %v500_v11  ;;  %v612_v57 = vadd.s32 %v1172_v28, %v504_v12  ;;  %v1168_v58 = vcvt.f32.s32 %v1167_v37  ;;  %v1176_v59 = vcvt.f32.s32 %v1175_v40  ;;  %692 = vmatprep.mubr.bf16.mxu0 (!%p1082_p9), %v1357_v62  ;;  %702 = vmatprep.mubr.bf16.mxu1 (!%p1082_p9), %v1360_v63 }
 0x233   : > { %615 = vst [vmem:[#allocation2] sm:$0xff] %v607_v43  ;;  %619 = vst [vmem:[#allocation2 + $0x20] sm:$0xff] %v611_v46  ;;  %v609_v60 = vadd.s32 %v1166_v49, %v501_v31  ;;  %v613_v61 = vadd.s32 %v1174_v53, %v505_v34  ;;  %693 = vmatmul.mubr.bf16.vlgmr.msra.gmra.mrb[0].mxu0 (!%p1082_p9), %v1355_v4  ;;  %703 = vmatmul.mubr.bf16.vlgmr.msra.gmra.mrb[0].mxu1 (!%p1082_p9), %v1358_v5 }
 0x234   : > { %616 = vst [vmem:[#allocation2 + $0x8] sm:$0xff] %v608_v56  ;;  %620 = vst [vmem:[#allocation2 + $0x28] sm:$0xff] %v612_v57  ;;  %v610_v0 = vadd.s32 %v1168_v58, %v502_v54  ;;  %v614_v1 = vadd.s32 %v1176_v59, %v506_v55 }
 0x235   : > { %617 = vst [vmem:[#allocation2 + $0x10] sm:$0xff] %v609_v60  ;;  %621 = vst [vmem:[#allocation2 + $0x30] sm:$0xff] %v613_v61 }
 0x236   : > { %618 = vst [vmem:[#allocation2 + $0x18] sm:$0xff] %v610_v0  ;;  %622 = vst [vmem:[#allocation2 + $0x38] sm:$0xff] %v614_v1 }
 0x306   : > { %v694_v15 = vpop.f32.mrb[0].mxu0  ;;  %v704_v17 = vpop.f32.mrb[0].mxu1 }
 0x307   : > { %v713_v21 = vadd.f32 %v694_v15, %v628_v6  ;;  %v717_v23 = vadd.f32 %v704_v17, %v632_v9  ;;  %v696_v24 = vpop.f32.mrb[1].mxu0  ;;  %v706_v26 = vpop.f32.mrb[1].mxu1 }
 0x308   : > { %v714_v30 = vadd.f32 %v696_v24, %v629_v10  ;;  %v718_v32 = vadd.f32 %v706_v26, %v633_v14  ;;  %v698_v33 = vpop.f32.mrb[2].mxu0  ;;  %v708_v35 = vpop.f32.mrb[2].mxu1 }
 0x309   : > { %721 = vst [vmem:[#allocation3] sm:$0xff] %v713_v21  ;;  %725 = vst [vmem:[#allocation3 + $0x20] sm:$0xff] %v717_v23  ;;  %v715_v36 = vadd.f32 %v698_v33, %v630_v18  ;;  %v719_v38 = vadd.f32 %v708_v35, %v634_v20  ;;  %v700_v39 = vpop.f32.mrb[3].mxu0  ;;  %v710_v41 = vpop.f32.mrb[3].mxu1 }
 0x30a   : > { %722 = vst [vmem:[#allocation3 + $0x8] sm:$0xff] %v714_v30  ;;  %726 = vst [vmem:[#allocation3 + $0x28] sm:$0xff] %v718_v32  ;;  %v716_v42 = vadd.f32 %v700_v39, %v631_v27  ;;  %v720_v44 = vadd.f32 %v710_v41, %v635_v29 }
 0x30b   : > { %723 = vst [vmem:[#allocation3 + $0x10] sm:$0xff] %v715_v36  ;;  %727 = vst [vmem:[#allocation3 + $0x30] sm:$0xff] %v719_v38 }
 0x30c   : > { %724 = vst [vmem:[#allocation3 + $0x18] sm:$0xff] %v716_v42  ;;  %728 = vst [vmem:[#allocation3 + $0x38] sm:$0xff] %v720_v44 }
 0x30d PF: > { %s2509_s1 = sld [smem:[#allocation24_spill]] }
 0x313   : > { %p1087_p4 = scmp.ne.s32.totalorder %s2509_s1, 2 }
 0x314   : > { %s2510_s15 = sld [smem:[#allocation33_spill]] (!%p1087_p4)  ;;  %v1672_v48 = vmov (!%p1087_p4), 0   ;;  %v776_v52 = vlaneseq (!%p1087_p4)  ;;  %v737_v3 = vld [vmem:[%s454_s12] sm:$0x3] (!%p1087_p4)  ;;  %v743_v16 = vld [vmem:[#allocation2 + $0x28] sm:$0xff] (!%p1087_p4)  ;;  %v744_v37 = vld [vmem:[#allocation2 + $0x30] sm:$0xff] (!%p1087_p4) }
 0x315   : > { %732 = sbr.rel (%p1087_p4) target bundleno = 937 (0x3a9), region = 68  ;;  %1362 = vset.pattern.permute.xlu1 (!%p1087_p4), %v1672_v48  ;;  %1361 = vset.pattern.permute.xlu0 (!%p1087_p4), %v1672_v48  ;;  %v810_v7 = vmul.f32 (!%p1087_p4), 0.007874016, %v737_v3  ;;  %v754_v8 = vmul.f32 (!%p1087_p4), 6.200012e-05, %v737_v3  ;;  %v742_v13 = vld [vmem:[#allocation2 + $0x20] sm:$0xff] (!%p1087_p4)  ;;  %v751_v55 = vcvt.s32.f32 (!%p1087_p4), %v743_v16  ;;  %v752_v60 = vcvt.s32.f32 (!%p1087_p4), %v744_v37 }
 0x316   : > { %v777_v2 = vshrl.u32 (!%p1087_p4), %v776_v52, 7  ;;  %v806_v19 = vld [vmem:[#allocation3 + $0x20] sm:$0xff] (!%p1087_p4)  ;;  %v739_v34 = vld [vmem:[#allocation2 + $0x8] sm:$0xff] (!%p1087_p4)  ;;  %v750_v54 = vcvt.s32.f32 (!%p1087_p4), %v742_v13  ;;  %v745_v59 = vld [vmem:[#allocation2 + $0x38] sm:$0xff] (!%p1087_p4) }
 0x317   : > { %v838_v22 = vld [vmem:[%s459_s5] sm:$0x3] (!%p1087_p4)  ;;  %v807_v46 = vld [vmem:[#allocation3 + $0x28] sm:$0xff] (!%p1087_p4)  ;;  %v747_v58 = vcvt.s32.f32 (!%p1087_p4), %v739_v34  ;;  %v808_v61 = vld [vmem:[#allocation3 + $0x30] sm:$0xff] (!%p1087_p4)  ;;  %v753_v24 = vcvt.s32.f32 (!%p1087_p4), %v745_v59 }
 0x318   : > { %v778_v11 = vsub.s32 (!%p1087_p4), 0, %v777_v2  ;;  %v782_v12 = vsub.s32 (!%p1087_p4), 1, %v777_v2  ;;  %v738_v31 = vld [vmem:[#allocation2] sm:$0xff] (!%p1087_p4)  ;;  %v803_v53 = vld [vmem:[#allocation3 + $0x8] sm:$0xff] (!%p1087_p4)  ;;  %v740_v0 = vld [vmem:[#allocation2 + $0x10] sm:$0xff] (!%p1087_p4) }
 0x319   : > { %v802_v49 = vld [vmem:[#allocation3] sm:$0xff] (!%p1087_p4)  ;;  %v746_v57 = vcvt.s32.f32 (!%p1087_p4), %v738_v31  ;;  %v741_v9 = vld [vmem:[#allocation2 + $0x18] sm:$0xff] (!%p1087_p4)  ;;  %v804_v20 = vld [vmem:[#allocation3 + $0x10] sm:$0xff] (!%p1087_p4)  ;;  %v748_v27 = vcvt.s32.f32 (!%p1087_p4), %v740_v0 }
 0x31a   : > { %s2511_s30 = smov (!%p1087_p4), %s2510_s15  ;;  %v735_v45 = vld [vmem:[%s2510_s15 + $0x10] sm:$0xff] (!%p1087_p4)  ;;  %v815_v25 = vrot.slane (!%p1087_p4), %v810_v7, %v778_v11  ;;  %v819_v28 = vrot.slane (!%p1087_p4), %v810_v7, %v782_v12  ;;  %v779_v40 = vrot.slane (!%p1087_p4), %v754_v8, %v778_v11  ;;  %v783_v43 = vrot.slane (!%p1087_p4), %v754_v8, %v782_v12  ;;  %v809_v18 = vld [vmem:[#allocation3 + $0x38] sm:$0xff] (!%p1087_p4) }
 0x31b   : > { %v733_v47 = vld [vmem:[%s2511_s30] sm:$0xff] (!%p1087_p4)  ;;  %767 = vperm.xlu1 (!%p1087_p4), %1362, %v735_v45   ;;  %v736_v50 = vld [vmem:[%s2511_s30 + $0x18] sm:$0xff] (!%p1087_p4)  ;;  %v734_v51 = vld [vmem:[%s2511_s30 + $0x8] sm:$0xff] (!%p1087_p4)  ;;  %v843_v56 = vrot.slane (!%p1087_p4), %v838_v22, %v778_v11  ;;  %v847_v23 = vrot.slane (!%p1087_p4), %v838_v22, %v782_v12  ;;  %v749_v38 = vcvt.s32.f32 (!%p1087_p4), %v741_v9 }
 0x31c   : > { %757 = vperm.xlu0 %1361, %v733_v47   ;;  %v826_v1 = vmul.f32 %v815_v25, %v806_v19  ;;  %v827_v62 = vmul.f32 %v819_v28, %v807_v46  ;;  %v822_v4 = vmul.f32 %v815_v25, %v802_v49  ;;  %v823_v5 = vmul.f32 %v819_v28, %v803_v53  ;;  %v805_v21 = vld [vmem:[#allocation3 + $0x18] sm:$0xff] }
 0x31d   : > { %v828_v26 = vmul.f32 %v815_v25, %v808_v61  ;;  %v829_v35 = vmul.f32 %v819_v28, %v809_v18  ;;  %v824_v39 = vmul.f32 %v815_v25, %v804_v20  ;;  %v825_v41 = vmul.f32 %v819_v28, %v805_v21 }
 0x31f   : > { %772 = vperm.xlu1 %1362, %v736_v50  }
 0x320   : > { %762 = vperm.xlu0 %1361, %v734_v51  }
 0x39a   : > { %v768_v63 = vpop.permute.xlu1 %767 }
 0x39b   : > { %v758_v6 = vpop.permute.xlu0 %757  ;;  %v790_v10 = vmul.f32 %v779_v40, %v768_v63  ;;  %v791_v14 = vmul.f32 %v783_v43, %v768_v63 }
 0x39c   : > { %v786_v15 = vmul.f32 %v779_v40, %v758_v6  ;;  %v787_v17 = vmul.f32 %v783_v43, %v758_v6 }
 0x39d   : > { %v798_v29 = vmul.f32 %v790_v10, %v750_v54  ;;  %v799_v30 = vmul.f32 %v791_v14, %v751_v55 }
 0x39e   : > { %v794_v32 = vmul.f32 %v786_v15, %v746_v57  ;;  %v795_v33 = vmul.f32 %v787_v17, %v747_v58  ;;  %v773_v36 = vpop.permute.xlu1 %772 }
 0x39f   : > { %v763_v42 = vpop.permute.xlu0 %762  ;;  %v834_v44 = vadd.f32 %v826_v1, %v798_v29  ;;  %v835_v45 = vadd.f32 %v827_v62, %v799_v30  ;;  %v792_v50 = vmul.f32 %v779_v40, %v773_v36  ;;  %v793_v51 = vmul.f32 %v783_v43, %v773_v36 }
 0x3a0   : > { %v830_v47 = vadd.f32 %v822_v4, %v794_v32  ;;  %v831_v48 = vadd.f32 %v823_v5, %v795_v33  ;;  %v788_v52 = vmul.f32 %v779_v40, %v763_v42  ;;  %v789_v2 = vmul.f32 %v783_v43, %v763_v42 }
 0x3a1   : > { %v854_v3 = vadd.f32 %v843_v56, %v834_v44  ;;  %v855_v7 = vadd.f32 %v847_v23, %v835_v45  ;;  %v800_v12 = vmul.f32 %v792_v50, %v752_v60  ;;  %v801_v13 = vmul.f32 %v793_v51, %v753_v24 }
 0x3a2   : > { %v850_v8 = vadd.f32 %v843_v56, %v830_v47  ;;  %v851_v11 = vadd.f32 %v847_v23, %v831_v48  ;;  %v796_v16 = vmul.f32 %v788_v52, %v748_v27  ;;  %v797_v19 = vmul.f32 %v789_v2, %v749_v38 }
 0x3a3   : > { %862 = vst [vmem:[%s2088_s8 + $0x20] sm:$0xff] %v854_v3  ;;  %863 = vst [vmem:[%s2088_s8 + $0x28] sm:$0xff] %v855_v7  ;;  %v836_v22 = vadd.f32 %v828_v26, %v800_v12  ;;  %v837_v25 = vadd.f32 %v829_v35, %v801_v13 }
 0x3a4   : > { %858 = vst [vmem:[%s2088_s8] sm:$0xff] %v850_v8  ;;  %859 = vst [vmem:[%s2088_s8 + $0x8] sm:$0xff] %v851_v11  ;;  %v832_v28 = vadd.f32 %v824_v39, %v796_v16  ;;  %v833_v31 = vadd.f32 %v825_v41, %v797_v19 }
 0x3a5   : > { %v856_v34 = vadd.f32 %v843_v56, %v836_v22  ;;  %v857_v37 = vadd.f32 %v847_v23, %v837_v25 }
 0x3a6   : > { %v852_v40 = vadd.f32 %v843_v56, %v832_v28  ;;  %v853_v43 = vadd.f32 %v847_v23, %v833_v31 }
 0x3a7   : > { %864 = vst [vmem:[%s2088_s8 + $0x30] sm:$0xff] %v856_v34  ;;  %865 = vst [vmem:[%s2088_s8 + $0x38] sm:$0xff] %v857_v37 }
 0x3a8   : > { %860 = vst [vmem:[%s2088_s8 + $0x10] sm:$0xff] %v852_v40  ;;  %861 = vst [vmem:[%s2088_s8 + $0x18] sm:$0xff] %v853_v43 }
 0x3a9 PF: > { %s2514_s19 = sld [smem:[#allocation25_spill]]  ;;  %s2515_s13 = sld [smem:[#allocation36_spill]] }
 0x3aa   : > { %s883_s25 = sshll.u32 %s2088_s8, 4  ;;  %s2353_s7 = scalar_lea.sflag [#allocation9], %s436_s9  ;;  %s2349_s25 = int_to_ptr.vmem [resolvable:$true] %s883_s25 }
 0x3ab   : > { %s1477_s11 = scalar_lea.vmem %s2349_s25, 1024  ;;  %p2516_p12 = scmp.ne.s32.totalorder %s2487_s16, 0 }
 0x3ac   : > { %p1478_p5 = scmp.ne.s32.totalorder %s2349_s25, %s1477_s11  ;;  %s1673_s1 = smov [#allocation13]  }
 0x3ad   : > { %s1481_s6 = sshll.u32 %s1673_s1, 4  ;;  %s1482_s6 = int_to_ptr.vmem [resolvable:$false] %s1481_s6 }
 0x3ae   : > { %p1479_p10 = pnand %p1478_p5, %p2516_p12  ;;  %s1483_s22 = scalar_lea.vmem %s1482_s6, 2048 }
 0x3af   : > { %s1095_s12 = sshll.u32 %s2514_s19, 8  ;;  %p1484_p6 = scmp.lt.s32.totalorder %s2349_s25, %s1482_s6 }
 0x3b0   : > { %s2346_s3 = scalar_lea.hbm %s2515_s13, %s1095_s12  ;;  %p1480_p8 = pneg %p1479_p10 }
 0x3b1   : > { %p1485_p2 = scmp.lt.s32.totalorder %s1483_s22, %s1477_s11 }
 0x3b3   : > { %p1486_p13 = por %p1485_p2, %p1484_p6 }
 0x3b5   : > { %p1487_p3 = pnand %p1486_p13, %p1480_p8 }
 0x3b7   : > { %1490 = shalt.err (!%p1487_p3)
}
 0x3b8   : > { %s1491_s9 = scalar_lea.hbm %s2346_s3, 1024  ;;  %s1495_s10 = scalar_lea.hbm %s2515_s13, 2048 }
 0x3b9   : > { %p1492_p11 = scmp.ne.s32.totalorder %s2346_s3, %s1491_s9  ;;  %p1496_p7 = scmp.lt.u32.totalorder %s2346_s3, %s2515_s13 }
 0x3ba   : > { %p1497_p9 = scmp.lt.u32.totalorder %s1495_s10, %s1491_s9  ;;  %p1499_p5 = scmp.lt.u32.totalorder %s1491_s9, %s2346_s3 }
 0x3bb   : > { %p1493_p1 = pnand %p1492_p11, %p2516_p12 }
 0x3bc   : > { %p1498_p4 = por %p1497_p9, %p1496_p7 }
 0x3bd   : > { %p1494_p0 = pneg %p1493_p1 }
 0x3be   : > { %p1500_p10 = por %p1499_p5, %p1498_p4 }
 0x3c0   : > { %p1501_p8 = pnand %p1500_p10, %p1494_p0 }
 0x3c2   : > { %1504 = shalt.err (!%p1501_p8)
}
 0x3c3   : > { %s1674_s5 = smov 256   ;;  %s1675_s24 = smov 512  }
 0x3c4   : > { %s1676_s11 = smov 16  }
 0x3c5   : > { %1185 = dma.vmem_to_hbm [thread:$0]  (%p2516_p12), %s2349_s25, 1024, %s2346_s3, %s2353_s7, %s1674_s5, %s1675_s24, %s1676_s11  }
 0x3c6 PF: > { %s2517_s1 = sld [smem:[#allocation21_spill]]  ;;  %p1204_p6 = scmp.ge.s32.totalorder %s1657_s29, 2 }
 0x3c7   : > { %p2518_p2 = scmp.ne.s32.totalorder %s2491_s0, 0 }
 0x3c9   : > { %p1200_p13 = pnand %p1204_p6, %p2518_p2 }
 0x3cc   : > { %s898_s6 = sand.u32 1, %s2517_s1  }
 0x3cd   : > { %s899_s22 = scalar_lea.sflag [#allocation9], %s898_s6 }
 0x3ce   : > { %1588 = dma.done.wait (!%p1200_p13), %s899_s22, 1024  }
 0x3cf   : > { %1590 = vsyncadd (!%p1200_p13), %s899_s22, 4294966272  ;;  %s37_s29 = sadd.s32 1, %s1657_s29   ;;  %s2520_s16 = sld [smem:[#allocation22_spill]] }
 0x3d0   : > { %p2382_p3 = scmp.ge.s32.totalorder %s37_s29, 8   ;;  %s2521_s15 = sld [smem:[#allocation30_spill]] }
 0x3d1   : > { %s2522_s3 = sld [smem:[#allocation31_spill]]  ;;  %s2523_s0 = sld [smem:[#allocation23_spill]] }
 0x3d2   : > { %s2524_s24 = sld [smem:[#allocation28_spill]]  ;;  %s2525_s7 = sld [smem:[#allocation26_spill]] }
 0x3d3   : > { %s2526_s8 = sld [smem:[#allocation27_spill]]  ;;  %s2527_s1 = smov %s1597_s14 }
 0x3d4   : > { %s2532_s19 = smov %s1621_s20  ;;  %s2533_s20 = smov %s1625_s21 }
 0x3d5   : > { %s2528_s14 = smov %s2520_s16  ;;  %s2529_s16 = smov %s1609_s17 }
 0x3d6   : > { %s2530_s17 = smov %s1613_s18  ;;  %s2531_s18 = smov %s2002_s26 }
 0x3d7   : > { %s2534_s21 = smov %s2522_s3  ;;  %s2535_s22 = smov %s1633_s23 }
 0x3d8   : > { %s2536_s23 = smov %s2523_s0  ;;  %s2537_s25 = smov %s1649_s27 }
 0x3d9   : > { %s2538_s26 = smov %s1653_s28  ;;  %s2539_s27 = smov %s2525_s7 }
 0x3da   : > { %s2540_s28 = smov %s2526_s8  ;;  %36 = sbr.rel (!%p2382_p3) target bundleno = 42 (0x2a), region = 134 }
 0x3e1   :  { %904 = vsyncpa [#allocation8], 1 }
 0x3e2   :  { %906 = vsyncpa [#allocation8 + $0x1], 1 }
 0x3e3   :  { %907 = vsyncpa [#allocation11], 1 }
 0x3e4   :  { %909 = vsyncpa [#allocation11 + $0x1], 1 }
 0x3e5   :  { %910 = vsyncpa [#allocation9], 1 }
 0x3e6   :  { %912 = vsyncpa [#allocation9 + $0x1], 1 }

</bundles_post_ra>
